<compile_context>
chip_gen: v6e
topology: v6e:2x2x1
jax: 0.10.0
libtpu: 0.0.40
codegen_flags: <defaults>
</compile_context>

<pallas_src>
import functools

import jax
import jax.numpy as jnp
import numpy as np
from jax.experimental import pallas as pl
from jax.experimental.pallas import tpu as pltpu


_MXU_DTYPE = jnp.bfloat16   # MXU-native operand dtype on v5e / v6e / v7x


def _vmem_limit_bytes():
    """Scoped-VMEM cap derived from the part: ~3/4 of physical, capped at 96 MiB."""
    try:
        cap = pltpu.get_tpu_info().vmem_capacity_bytes
    except Exception:
        cap = 64 * 1024 * 1024          # be conservative (v7x-sized) if query unavailable
    return int(min(cap * 3 // 4, 96 * 1024 * 1024))


def _pick_tile(n, per_unit_bytes, budget, *, min_split=8, require_mult8=False):
    """Largest divisor of n fitting `budget`; prefer a proper split >= min_split so the
    auto-pipeliner / megacore gets more than one step."""
    divs = sorted((t for t in range(1, n + 1) if n % t == 0), reverse=True)
    fits = [t for t in divs if t * per_unit_bytes <= budget] or [1]

    def ok(t):
        return (not require_mult8) or t % 8 == 0 or t == n

    split = [t for t in fits if t < n and t >= min_split and ok(t)]
    if split:
        return split[0]
    full = [t for t in fits if ok(t)]
    return full[0] if full else n


# --------------------------------------------------------------------------------------
# Kernels 1/2: 3x3 dilated conv (+ optional fused BN1-affine+ReLU pre-op) + BN partials
# --------------------------------------------------------------------------------------
def _conv_stats_kernel(*refs, d, th, pre_affine_relu):
    if pre_affine_relu:
        x_ref, scale_ref, shift_ref, w_ref, y_ref, stats_ref, pad_ref = refs
    else:
        x_ref, w_ref, y_ref, stats_ref, pad_ref = refs
        scale_ref = shift_ref = None

    _, H, W, C = x_ref.shape
    Co = w_ref.shape[1]
    Wp = W + 2 * d                      # padded width
    Hs = th + 2 * d                     # padded strip height
    f32 = jnp.float32
    cdt = pad_ref.dtype                 # bf16 MXU-operand dtype

    s = pl.program_id(1)
    last = pl.num_programs(1) - 1
    h0 = s * th
    if th % 8 == 0:
        h0 = pl.multiple_of(h0, 8)

    def prep(row_start, nrows):
        """Load rows of x, apply the fused BN1 affine + ReLU (f32), cast to bf16."""
        v = x_ref[0, pl.ds(row_start, nrows), :, :].astype(f32)
        if pre_affine_relu:
            v = jnp.maximum(v * scale_ref[...].reshape(1, 1, C)
                            + shift_ref[...].reshape(1, 1, C), 0.0)
        return v.astype(cdt)

    # Build the zero-padded strip in VMEM. Every element is written exactly once per step;
    # only the d-wide halo is zero-filled (no full-array memset, no im2col copies).
    pad_ref[:, 0:d, :] = jnp.zeros((Hs, d, C), cdt)              # left columns (+corners)
    pad_ref[:, W + d:Wp, :] = jnp.zeros((Hs, d, C), cdt)         # right columns (+corners)
    pad_ref[d:th + d, d:W + d, :] = prep(h0, th)                 # strip interior

    @pl.when(s == 0)
    def _():                                                     # top image border -> zeros
        pad_ref[0:d, d:W + d, :] = jnp.zeros((d, W, C), cdt)

    @pl.when(s > 0)
    def _():                                                     # top halo from prev rows
        pad_ref[0:d, d:W + d, :] = prep(h0 - d, d)

    @pl.when(s == last)
    def _():                                                     # bottom image border
        pad_ref[th + d:Hs, d:W + d, :] = jnp.zeros((d, W, C), cdt)

    @pl.when(s < last)
    def _():                                                     # bottom halo from next rows
        pad_ref[th + d:Hs, d:W + d, :] = prep(h0 + th, d)

    # 9 shifted bf16 MXU matmuls accumulated in an f32 register value (no im2col scratch).
    acc = jnp.zeros((th * W, Co), f32)
    for kh in range(3):
        for kw in range(3):
            t = kh * 3 + kw
            patch = pad_ref[kh * d:kh * d + th, kw * d:kw * d + W, :].reshape(th * W, C)
            acc = acc + jnp.dot(patch, w_ref[t * C:(t + 1) * C, :],
                                preferred_element_type=f32)

    y_ref[...] = acc.reshape(1, th, W, Co).astype(y_ref.dtype)   # bf16 intermediate to HBM

    # Single-pass BatchNorm partials for this block (kept in f32): [sum; sum_sq].
    ssum = jnp.sum(acc, axis=0, keepdims=True)                   # (1, Co)
    ssq = jnp.sum(acc * acc, axis=0, keepdims=True)              # (1, Co)
    stats_ref[...] = jnp.concatenate([ssum, ssq], axis=0).reshape(1, 1, 2, Co)


def _make_conv_call(N, H, W, C, Co, d, th, *, pre_affine_relu, out_dtype, vmem_limit):
    n_strips = H // th
    Hs, Wp = th + 2 * d, W + 2 * d
    kernel = functools.partial(_conv_stats_kernel, d=d, th=th,
                               pre_affine_relu=pre_affine_relu)

    in_specs = [pl.BlockSpec((1, H, W, C), lambda n, s: (n, 0, 0, 0))]
    if pre_affine_relu:
        in_specs += [pl.BlockSpec((1, C), lambda n, s: (0, 0)),
                     pl.BlockSpec((1, C), lambda n, s: (0, 0))]
    in_specs += [pl.BlockSpec((9 * C, Co), lambda n, s: (0, 0))]

    return pl.pallas_call(
        kernel,
        out_shape=(jax.ShapeDtypeStruct((N, H, W, Co), out_dtype),
                   jax.ShapeDtypeStruct((N, n_strips, 2, Co), jnp.float32)),
        grid=(N, n_strips),
        in_specs=in_specs,
        out_specs=(pl.BlockSpec((1, th, W, Co), lambda n, s: (n, s, 0, 0)),
                   pl.BlockSpec((1, 1, 2, Co), lambda n, s: (n, s, 0, 0))),
        scratch_shapes=[pltpu.VMEM((Hs, Wp, C), _MXU_DTYPE)],    # zero-padded strip (bf16)
        compiler_params=pltpu.CompilerParams(
            dimension_semantics=("parallel", "parallel"),
            vmem_limit_bytes=vmem_limit),
    )


# --------------------------------------------------------------------------------------
# Kernel 3: BN2 affine + residual add + ReLU, on a lane-dense (rows, W*C) layout
# --------------------------------------------------------------------------------------
def _bn_add_relu_kernel(y_ref, x_ref, scale_ref, shift_ref, o_ref):
    v = (y_ref[...].astype(jnp.float32) * scale_ref[...] + shift_ref[...]
         + x_ref[...].astype(jnp.float32))
    o_ref[...] = jnp.maximum(v, 0.0).astype(o_ref.dtype)


def _make_bn_add_relu_call(rows, lanes, y_dtype, out_dtype, vmem_limit):
    per_row = lanes * (jnp.dtype(y_dtype).itemsize
                       + 2 * jnp.dtype(out_dtype).itemsize) * 2   # y + x + out, double-buffered
    tr = _pick_tile(rows, per_row, max(vmem_limit // 4, 2 << 20),
                    min_split=8, require_mult8=True)
    return pl.pallas_call(
        _bn_add_relu_kernel,
        out_shape=jax.ShapeDtypeStruct((rows, lanes), out_dtype),
        grid=(rows // tr,),
        in_specs=[pl.BlockSpec((tr, lanes), lambda i: (i, 0)),
                  pl.BlockSpec((tr, lanes), lambda i: (i, 0)),
                  pl.BlockSpec((1, lanes), lambda i: (0, 0)),
                  pl.BlockSpec((1, lanes), lambda i: (0, 0))],
        out_specs=pl.BlockSpec((tr, lanes), lambda i: (i, 0)),
        compiler_params=pltpu.CompilerParams(
            dimension_semantics=("parallel",),
            vmem_limit_bytes=vmem_limit),
    )


# --------------------------------------------------------------------------------------
# Wrapper
# --------------------------------------------------------------------------------------
def _finalize_bn(stats, gamma, beta, count, eps):
    """(N, S, 2, C) partial [sum, sum_sq] -> per-channel (scale, shift) for y*scale + shift."""
    f32 = jnp.float32
    tot = jnp.sum(stats.astype(f32), axis=(0, 1))               # (2, C)
    mean = tot[0] / count
    var = tot[1] / count - mean * mean                          # biased variance (training BN)
    inv = jax.lax.rsqrt(var + eps)
    scale = gamma.astype(f32) * inv
    shift = beta.astype(f32) - mean * scale
    return scale.reshape(1, -1), shift.reshape(1, -1)


def residual_block_nhwc(x, w1, g1, b1, w2, g2, b2, *, dilation=1, eps=1e-5):
    """NHWC residual block: ReLU(BN2(conv2(ReLU(BN1(conv1(x))))) + x)."""
    N, H, W, C = x.shape
    d = dilation
    assert w1.shape == (C, C, 3, 3) and w2.shape == (C, C, 3, 3), \
        "identity-shortcut path requires in_c == out_c"

    vmem_limit = _vmem_limit_bytes()

    # Conv weights: PyTorch (out,in,kh,kw) -> (kh*kw*in, out) tap-major rows; bf16 MXU operands.
    w1k = jnp.transpose(w1, (2, 3, 1, 0)).reshape(9 * C, C).astype(_MXU_DTYPE)
    w2k = jnp.transpose(w2, (2, 3, 1, 0)).reshape(9 * C, C).astype(_MXU_DTYPE)

    # Row-strip height for the conv passes: bounds the padded scratch / accumulator while
    # giving the pipeline (and v7x megacore) more than one step per image.
    per_row = (W + 2 * d) * C * 2 + W * C * (4 + 2 * 2)         # pad row + acc row + y blocks
    th = _pick_tile(H, per_row, max(vmem_limit // 8, 1 << 20), min_split=8)
    if th < d:            # halos must fit inside one neighbouring strip
        th = H

    conv1 = _make_conv_call(N, H, W, C, C, d, th, pre_affine_relu=False,
                            out_dtype=_MXU_DTYPE, vmem_limit=vmem_limit)
    conv2 = _make_conv_call(N, H, W, C, C, d, th, pre_affine_relu=True,
                            out_dtype=_MXU_DTYPE, vmem_limit=vmem_limit)

    y1, st1 = conv1(x, w1k)                                     # conv1 + BN1 partials (y1 bf16)
    scale1, shift1 = _finalize_bn(st1, g1, b1, N * H * W, eps)

    y2, st2 = conv2(y1, scale1, shift1, w2k)                    # BN1+ReLU+conv2 + BN2 partials
    scale2, shift2 = _finalize_bn(st2, g2, b2, N * H * W, eps)

    rows, lanes = N * H, W * C
    bn3 = _make_bn_add_relu_call(rows, lanes, y2.dtype, x.dtype, vmem_limit)
    out2d = bn3(y2.reshape(rows, lanes),
                x.reshape(rows, lanes),                         # identity residual
                jnp.tile(scale2, (1, W)),                       # per-channel -> per (w,c) lane
                jnp.tile(shift2, (1, W)))
    return out2d.reshape(N, H, W, C)


def residual_block(x_nchw, w1, g1, b1, w2, g2, b2, *, dilation=1, eps=1e-5):
    """NCHW wrapper matching the PyTorch module's layout.
    TODO(synk): keep NHWC end-to-end in the surrounding model and call residual_block_nhwc
    directly to drop these two transposes (each is a full HBM read+write of the activation)."""
    x = jnp.transpose(x_nchw, (0, 2, 3, 1))
    out = residual_block_nhwc(x, w1, g1, b1, w2, g2, b2, dilation=dilation, eps=eps)
    return jnp.transpose(out, (0, 3, 1, 2))


# --------------------------------------------------------------------------------------
# Pure-JAX f32 reference mirroring the PyTorch forward (training-mode BN)
# --------------------------------------------------------------------------------------
def _reference(x_nchw, w1, g1, b1, w2, g2, b2, *, dilation=1, eps=1e-5):
    d = dilation
    x = jnp.transpose(x_nchw, (0, 2, 3, 1))

    def conv(inp, w):
        w_hwio = jnp.transpose(w, (2, 3, 1, 0))
        return jax.lax.conv_general_dilated(
            inp, w_hwio, (1, 1), [(d, d), (d, d)], rhs_dilation=(d, d),
            dimension_numbers=('NHWC', 'HWIO', 'NHWC'))

    def bn(inp, g, b):
        m = jnp.mean(inp, axis=(0, 1, 2), keepdims=True)
        v = jnp.mean((inp - m) ** 2, axis=(0, 1, 2), keepdims=True)
        return (inp - m) * jax.lax.rsqrt(v + eps) * g.reshape(1, 1, 1, -1) + b.reshape(1, 1, 1, -1)

    h = jax.nn.relu(bn(conv(x, w1), g1, b1))
    out = jax.nn.relu(bn(conv(h, w2), g2, b2) + x)
    return jnp.transpose(out, (0, 3, 1, 2))


if __name__ == "__main__":
    N, C, H, W = 2, 4, 16, 16        # in_c == out_c (required for the identity shortcut)
    key = jax.random.PRNGKey(0)
    kx, kw1, kw2, kg1, kb1, kg2, kb2 = jax.random.split(key, 7)

    x = jax.random.normal(kx, (N, C, H, W), jnp.float32)
    w1 = jax.random.normal(kw1, (C, C, 3, 3), jnp.float32) * 0.1      # PyTorch (out,in,kh,kw)
    w2 = jax.random.normal(kw2, (C, C, 3, 3), jnp.float32) * 0.1
    g1 = 1.0 + 0.1 * jax.random.normal(kg1, (C,), jnp.float32)        # BN gamma
    b1 = 0.1 * jax.random.normal(kb1, (C,), jnp.float32)              # BN beta
    g2 = 1.0 + 0.1 * jax.random.normal(kg2, (C,), jnp.float32)
    b2 = 0.1 * jax.random.normal(kb2, (C,), jnp.float32)

    out = residual_block(x, w1, g1, b1, w2, g2, b2, dilation=1)
    out = jax.block_until_ready(out)

    ref = _reference(x, w1, g1, b1, w2, g2, b2, dilation=1)
    # bf16 MXU operands + bf16 HBM intermediates vs. the all-f32 reference dominate the error.
    err = np.abs(np.asarray(out) - np.asarray(ref))
    np.testing.assert_allclose(np.asarray(out), np.asarray(ref), atol=1e-1, rtol=1e-1)
    assert float(err.mean()) < 2e-2, f"mean abs err too large: {float(err.mean())}"

    print("KERNEL_OK")
</pallas_src>

<mosaic_0001>
module attributes {stable_mosaic.version = 11 : i64} {
  func.func @_conv_stats_kernel(%arg0: i32, %arg1: i32, %arg2: memref<1x16x16x4xf32, #tpu.memory_space<vmem>>, %arg3: memref<36x4xbf16, #tpu.memory_space<vmem>>, %arg4: memref<1x8x16x4xbf16, #tpu.memory_space<vmem>>, %arg5: memref<1x1x2x4xf32, #tpu.memory_space<vmem>>, %arg6: memref<10x18x4xbf16, #tpu.memory_space<vmem>>) attributes {dimension_semantics = [#tpu.dimension_semantics<parallel>, #tpu.dimension_semantics<parallel>], iteration_bounds = array<i64: 2, 2>, scalar_prefetch = 0 : i64, scratch_operands = 1 : i64, tpu.core_type = #tpu.core_type<tc>, window_params = [{transform_indices = @transform_0, window_bounds = array<i64: 1, 16, 16, 4>}, {pipeline_mode = #tpu.pipeline_mode<synchronous>, transform_indices = @transform_1, window_bounds = array<i64: 36, 4>}, {transform_indices = @transform_2, window_bounds = array<i64: 1, 8, 16, 4>}, {transform_indices = @transform_3, window_bounds = array<i64: 1, 1, 2, 4>}]} {
    %c8_i32 = arith.constant 8 : i32
    %0 = arith.muli %arg1, %c8_i32 : i32
    %1 = tpu.assume_multiple %0, 8 : i32
    %cst = arith.constant 0.000000e+00 : bf16
    %2 = vector.broadcast %cst : bf16 to vector<10x1x4xbf16>
    %c0 = arith.constant 0 : index
    %c0_0 = arith.constant 0 : index
    %c0_1 = arith.constant 0 : index
    %3 = vector.load %arg6[%c0, %c0_0, %c0_1] : memref<10x18x4xbf16, #tpu.memory_space<vmem>>, vector<10x1x4xbf16>
    tpu.vector_store %arg6[%c0, %c0_0, %c0_1], %2 {strides = array<i32>} : memref<10x18x4xbf16, #tpu.memory_space<vmem>>, vector<10x1x4xbf16>,
    %cst_2 = arith.constant 0.000000e+00 : bf16
    %4 = vector.broadcast %cst_2 : bf16 to vector<10x1x4xbf16>
    %c0_3 = arith.constant 0 : index
    %c17 = arith.constant 17 : index
    %c0_4 = arith.constant 0 : index
    %5 = vector.load %arg6[%c0_3, %c17, %c0_4] : memref<10x18x4xbf16, #tpu.memory_space<vmem>>, vector<10x1x4xbf16>
    tpu.vector_store %arg6[%c0_3, %c17, %c0_4], %4 {strides = array<i32>} : memref<10x18x4xbf16, #tpu.memory_space<vmem>>, vector<10x1x4xbf16>,
    %c0_5 = arith.constant 0 : index
    %6 = arith.index_cast %1 : i32 to index
    %c0_6 = arith.constant 0 : index
    %c0_7 = arith.constant 0 : index
    %7 = vector.load %arg2[%c0_5, %6, %c0_6, %c0_7] : memref<1x16x16x4xf32, #tpu.memory_space<vmem>>, vector<1x8x16x4xf32>
    %8 = vector.shape_cast %7 : vector<1x8x16x4xf32> to vector<8x16x4xf32>
    %9 = arith.truncf %8 : vector<8x16x4xf32> to vector<8x16x4xbf16>
    %c1 = arith.constant 1 : index
    %c1_8 = arith.constant 1 : index
    %c0_9 = arith.constant 0 : index
    %10 = vector.load %arg6[%c1, %c1_8, %c0_9] : memref<10x18x4xbf16, #tpu.memory_space<vmem>>, vector<8x16x4xbf16>
    tpu.vector_store %arg6[%c1, %c1_8, %c0_9], %9 {strides = array<i32>} : memref<10x18x4xbf16, #tpu.memory_space<vmem>>, vector<8x16x4xbf16>,
    %c0_i32 = arith.constant 0 : i32
    %11 = arith.cmpi eq, %arg1, %c0_i32 : i32
    %12 = arith.extui %11 : i1 to i32
    %c0_i32_10 = arith.constant 0 : i32
    %13 = arith.cmpi ne, %12, %c0_i32_10 : i32
    scf.if %13 {
      %cst_72 = arith.constant 0.000000e+00 : bf16
      %80 = vector.broadcast %cst_72 : bf16 to vector<1x16x4xbf16>
      %c0_73 = arith.constant 0 : index
      %c1_74 = arith.constant 1 : index
      %c0_75 = arith.constant 0 : index
      %81 = vector.load %arg6[%c0_73, %c1_74, %c0_75] : memref<10x18x4xbf16, #tpu.memory_space<vmem>>, vector<1x16x4xbf16>
      tpu.vector_store %arg6[%c0_73, %c1_74, %c0_75], %80 {strides = array<i32>} : memref<10x18x4xbf16, #tpu.memory_space<vmem>>, vector<1x16x4xbf16>,
    } else {
    }
    %c0_i32_11 = arith.constant 0 : i32
    %14 = arith.cmpi sgt, %arg1, %c0_i32_11 : i32
    %15 = arith.extui %14 : i1 to i32
    %c0_i32_12 = arith.constant 0 : i32
    %16 = arith.cmpi ne, %15, %c0_i32_12 : i32
    scf.if %16 {
      %c1_i32_72 = arith.constant 1 : i32
      %80 = arith.subi %1, %c1_i32_72 : i32
      %c0_73 = arith.constant 0 : index
      %81 = arith.index_cast %80 : i32 to index
      %c0_74 = arith.constant 0 : index
      %c0_75 = arith.constant 0 : index
      %82 = vector.load %arg2[%c0_73, %81, %c0_74, %c0_75] : memref<1x16x16x4xf32, #tpu.memory_space<vmem>>, vector<1x1x16x4xf32>
      %83 = vector.shape_cast %82 : vector<1x1x16x4xf32> to vector<1x16x4xf32>
      %84 = arith.truncf %83 : vector<1x16x4xf32> to vector<1x16x4xbf16>
      %c0_76 = arith.constant 0 : index
      %c1_77 = arith.constant 1 : index
      %c0_78 = arith.constant 0 : index
      %85 = vector.load %arg6[%c0_76, %c1_77, %c0_78] : memref<10x18x4xbf16, #tpu.memory_space<vmem>>, vector<1x16x4xbf16>
      tpu.vector_store %arg6[%c0_76, %c1_77, %c0_78], %84 {strides = array<i32>} : memref<10x18x4xbf16, #tpu.memory_space<vmem>>, vector<1x16x4xbf16>,
    } else {
    }
    %c1_i32 = arith.constant 1 : i32
    %17 = arith.cmpi eq, %arg1, %c1_i32 : i32
    %18 = arith.extui %17 : i1 to i32
    %c0_i32_13 = arith.constant 0 : i32
    %19 = arith.cmpi ne, %18, %c0_i32_13 : i32
    scf.if %19 {
      %cst_72 = arith.constant 0.000000e+00 : bf16
      %80 = vector.broadcast %cst_72 : bf16 to vector<1x16x4xbf16>
      %c9 = arith.constant 9 : index
      %c1_73 = arith.constant 1 : index
      %c0_74 = arith.constant 0 : index
      %81 = vector.load %arg6[%c9, %c1_73, %c0_74] : memref<10x18x4xbf16, #tpu.memory_space<vmem>>, vector<1x16x4xbf16>
      tpu.vector_store %arg6[%c9, %c1_73, %c0_74], %80 {strides = array<i32>} : memref<10x18x4xbf16, #tpu.memory_space<vmem>>, vector<1x16x4xbf16>,
    } else {
    }
    %c1_i32_14 = arith.constant 1 : i32
    %20 = arith.cmpi slt, %arg1, %c1_i32_14 : i32
    %21 = arith.extui %20 : i1 to i32
    %c0_i32_15 = arith.constant 0 : i32
    %22 = arith.cmpi ne, %21, %c0_i32_15 : i32
    scf.if %22 {
      %c8_i32_72 = arith.constant 8 : i32
      %80 = arith.addi %1, %c8_i32_72 : i32
      %c0_73 = arith.constant 0 : index
      %81 = arith.index_cast %80 : i32 to index
      %c0_74 = arith.constant 0 : index
      %c0_75 = arith.constant 0 : index
      %82 = vector.load %arg2[%c0_73, %81, %c0_74, %c0_75] : memref<1x16x16x4xf32, #tpu.memory_space<vmem>>, vector<1x1x16x4xf32>
      %83 = vector.shape_cast %82 : vector<1x1x16x4xf32> to vector<1x16x4xf32>
      %84 = arith.truncf %83 : vector<1x16x4xf32> to vector<1x16x4xbf16>
      %c9 = arith.constant 9 : index
      %c1_76 = arith.constant 1 : index
      %c0_77 = arith.constant 0 : index
      %85 = vector.load %arg6[%c9, %c1_76, %c0_77] : memref<10x18x4xbf16, #tpu.memory_space<vmem>>, vector<1x16x4xbf16>
      tpu.vector_store %arg6[%c9, %c1_76, %c0_77], %84 {strides = array<i32>} : memref<10x18x4xbf16, #tpu.memory_space<vmem>>, vector<1x16x4xbf16>,
    } else {
    }
    %cst_16 = arith.constant 0.000000e+00 : f32
    %23 = vector.broadcast %cst_16 : f32 to vector<128x4xf32>
    %c0_17 = arith.constant 0 : index
    %c0_18 = arith.constant 0 : index
    %c0_19 = arith.constant 0 : index
    %24 = vector.load %arg6[%c0_17, %c0_18, %c0_19] : memref<10x18x4xbf16, #tpu.memory_space<vmem>>, vector<8x16x4xbf16>
    %25 = vector.shape_cast %24 : vector<8x16x4xbf16> to vector<128x4xbf16>
    %c0_20 = arith.constant 0 : index
    %c0_21 = arith.constant 0 : index
    %26 = vector.load %arg3[%c0_20, %c0_21] : memref<36x4xbf16, #tpu.memory_space<vmem>>, vector<4x4xbf16>
    %cst_22 = arith.constant dense<0.000000e+00> : vector<128x4xf32>
    %27 = tpu.matmul %25, %26, %cst_22 {dimension_numbers = #tpu.dot_dimension_numbers<[1], [0], [0], [1], [0, 0, 1, 1], [], []>} : vector<128x4xbf16>, vector<4x4xbf16>, vector<128x4xf32> -> vector<128x4xf32>
    %28 = arith.addf %23, %27 : vector<128x4xf32>
    %c0_23 = arith.constant 0 : index
    %c1_24 = arith.constant 1 : index
    %c0_25 = arith.constant 0 : index
    %29 = vector.load %arg6[%c0_23, %c1_24, %c0_25] : memref<10x18x4xbf16, #tpu.memory_space<vmem>>, vector<8x16x4xbf16>
    %30 = vector.shape_cast %29 : vector<8x16x4xbf16> to vector<128x4xbf16>
    %c4 = arith.constant 4 : index
    %c0_26 = arith.constant 0 : index
    %31 = vector.load %arg3[%c4, %c0_26] : memref<36x4xbf16, #tpu.memory_space<vmem>>, vector<4x4xbf16>
    %cst_27 = arith.constant dense<0.000000e+00> : vector<128x4xf32>
    %32 = tpu.matmul %30, %31, %cst_27 {dimension_numbers = #tpu.dot_dimension_numbers<[1], [0], [0], [1], [0, 0, 1, 1], [], []>} : vector<128x4xbf16>, vector<4x4xbf16>, vector<128x4xf32> -> vector<128x4xf32>
    %33 = arith.addf %28, %32 : vector<128x4xf32>
    %c0_28 = arith.constant 0 : index
    %c2 = arith.constant 2 : index
    %c0_29 = arith.constant 0 : index
    %34 = vector.load %arg6[%c0_28, %c2, %c0_29] : memref<10x18x4xbf16, #tpu.memory_space<vmem>>, vector<8x16x4xbf16>
    %35 = vector.shape_cast %34 : vector<8x16x4xbf16> to vector<128x4xbf16>
    %c8 = arith.constant 8 : index
    %c0_30 = arith.constant 0 : index
    %36 = vector.load %arg3[%c8, %c0_30] : memref<36x4xbf16, #tpu.memory_space<vmem>>, vector<4x4xbf16>
    %cst_31 = arith.constant dense<0.000000e+00> : vector<128x4xf32>
    %37 = tpu.matmul %35, %36, %cst_31 {dimension_numbers = #tpu.dot_dimension_numbers<[1], [0], [0], [1], [0, 0, 1, 1], [], []>} : vector<128x4xbf16>, vector<4x4xbf16>, vector<128x4xf32> -> vector<128x4xf32>
    %38 = arith.addf %33, %37 : vector<128x4xf32>
    %c1_32 = arith.constant 1 : index
    %c0_33 = arith.constant 0 : index
    %c0_34 = arith.constant 0 : index
    %39 = vector.load %arg6[%c1_32, %c0_33, %c0_34] : memref<10x18x4xbf16, #tpu.memory_space<vmem>>, vector<8x16x4xbf16>
    %40 = vector.shape_cast %39 : vector<8x16x4xbf16> to vector<128x4xbf16>
    %c12 = arith.constant 12 : index
    %c0_35 = arith.constant 0 : index
    %41 = vector.load %arg3[%c12, %c0_35] : memref<36x4xbf16, #tpu.memory_space<vmem>>, vector<4x4xbf16>
    %cst_36 = arith.constant dense<0.000000e+00> : vector<128x4xf32>
    %42 = tpu.matmul %40, %41, %cst_36 {dimension_numbers = #tpu.dot_dimension_numbers<[1], [0], [0], [1], [0, 0, 1, 1], [], []>} : vector<128x4xbf16>, vector<4x4xbf16>, vector<128x4xf32> -> vector<128x4xf32>
    %43 = arith.addf %38, %42 : vector<128x4xf32>
    %c1_37 = arith.constant 1 : index
    %c1_38 = arith.constant 1 : index
    %c0_39 = arith.constant 0 : index
    %44 = vector.load %arg6[%c1_37, %c1_38, %c0_39] : memref<10x18x4xbf16, #tpu.memory_space<vmem>>, vector<8x16x4xbf16>
    %45 = vector.shape_cast %44 : vector<8x16x4xbf16> to vector<128x4xbf16>
    %c16 = arith.constant 16 : index
    %c0_40 = arith.constant 0 : index
    %46 = vector.load %arg3[%c16, %c0_40] : memref<36x4xbf16, #tpu.memory_space<vmem>>, vector<4x4xbf16>
    %cst_41 = arith.constant dense<0.000000e+00> : vector<128x4xf32>
    %47 = tpu.matmul %45, %46, %cst_41 {dimension_numbers = #tpu.dot_dimension_numbers<[1], [0], [0], [1], [0, 0, 1, 1], [], []>} : vector<128x4xbf16>, vector<4x4xbf16>, vector<128x4xf32> -> vector<128x4xf32>
    %48 = arith.addf %43, %47 : vector<128x4xf32>
    %c1_42 = arith.constant 1 : index
    %c2_43 = arith.constant 2 : index
    %c0_44 = arith.constant 0 : index
    %49 = vector.load %arg6[%c1_42, %c2_43, %c0_44] : memref<10x18x4xbf16, #tpu.memory_space<vmem>>, vector<8x16x4xbf16>
    %50 = vector.shape_cast %49 : vector<8x16x4xbf16> to vector<128x4xbf16>
    %c20 = arith.constant 20 : index
    %c0_45 = arith.constant 0 : index
    %51 = vector.load %arg3[%c20, %c0_45] : memref<36x4xbf16, #tpu.memory_space<vmem>>, vector<4x4xbf16>
    %cst_46 = arith.constant dense<0.000000e+00> : vector<128x4xf32>
    %52 = tpu.matmul %50, %51, %cst_46 {dimension_numbers = #tpu.dot_dimension_numbers<[1], [0], [0], [1], [0, 0, 1, 1], [], []>} : vector<128x4xbf16>, vector<4x4xbf16>, vector<128x4xf32> -> vector<128x4xf32>
    %53 = arith.addf %48, %52 : vector<128x4xf32>
    %c2_47 = arith.constant 2 : index
    %c0_48 = arith.constant 0 : index
    %c0_49 = arith.constant 0 : index
    %54 = vector.load %arg6[%c2_47, %c0_48, %c0_49] : memref<10x18x4xbf16, #tpu.memory_space<vmem>>, vector<8x16x4xbf16>
    %55 = vector.shape_cast %54 : vector<8x16x4xbf16> to vector<128x4xbf16>
    %c24 = arith.constant 24 : index
    %c0_50 = arith.constant 0 : index
    %56 = vector.load %arg3[%c24, %c0_50] : memref<36x4xbf16, #tpu.memory_space<vmem>>, vector<4x4xbf16>
    %cst_51 = arith.constant dense<0.000000e+00> : vector<128x4xf32>
    %57 = tpu.matmul %55, %56, %cst_51 {dimension_numbers = #tpu.dot_dimension_numbers<[1], [0], [0], [1], [0, 0, 1, 1], [], []>} : vector<128x4xbf16>, vector<4x4xbf16>, vector<128x4xf32> -> vector<128x4xf32>
    %58 = arith.addf %53, %57 : vector<128x4xf32>
    %c2_52 = arith.constant 2 : index
    %c1_53 = arith.constant 1 : index
    %c0_54 = arith.constant 0 : index
    %59 = vector.load %arg6[%c2_52, %c1_53, %c0_54] : memref<10x18x4xbf16, #tpu.memory_space<vmem>>, vector<8x16x4xbf16>
    %60 = vector.shape_cast %59 : vector<8x16x4xbf16> to vector<128x4xbf16>
    %c28 = arith.constant 28 : index
    %c0_55 = arith.constant 0 : index
    %61 = vector.load %arg3[%c28, %c0_55] : memref<36x4xbf16, #tpu.memory_space<vmem>>, vector<4x4xbf16>
    %cst_56 = arith.constant dense<0.000000e+00> : vector<128x4xf32>
    %62 = tpu.matmul %60, %61, %cst_56 {dimension_numbers = #tpu.dot_dimension_numbers<[1], [0], [0], [1], [0, 0, 1, 1], [], []>} : vector<128x4xbf16>, vector<4x4xbf16>, vector<128x4xf32> -> vector<128x4xf32>
    %63 = arith.addf %58, %62 : vector<128x4xf32>
    %c2_57 = arith.constant 2 : index
    %c2_58 = arith.constant 2 : index
    %c0_59 = arith.constant 0 : index
    %64 = vector.load %arg6[%c2_57, %c2_58, %c0_59] : memref<10x18x4xbf16, #tpu.memory_space<vmem>>, vector<8x16x4xbf16>
    %65 = vector.shape_cast %64 : vector<8x16x4xbf16> to vector<128x4xbf16>
    %c32 = arith.constant 32 : index
    %c0_60 = arith.constant 0 : index
    %66 = vector.load %arg3[%c32, %c0_60] : memref<36x4xbf16, #tpu.memory_space<vmem>>, vector<4x4xbf16>
    %cst_61 = arith.constant dense<0.000000e+00> : vector<128x4xf32>
    %67 = tpu.matmul %65, %66, %cst_61 {dimension_numbers = #tpu.dot_dimension_numbers<[1], [0], [0], [1], [0, 0, 1, 1], [], []>} : vector<128x4xbf16>, vector<4x4xbf16>, vector<128x4xf32> -> vector<128x4xf32>
    %68 = arith.addf %63, %67 : vector<128x4xf32>
    %69 = vector.shape_cast %68 : vector<128x4xf32> to vector<1x8x16x4xf32>
    %70 = arith.truncf %69 : vector<1x8x16x4xf32> to vector<1x8x16x4xbf16>
    %c0_62 = arith.constant 0 : index
    %c0_63 = arith.constant 0 : index
    %c0_64 = arith.constant 0 : index
    %c0_65 = arith.constant 0 : index
    %71 = vector.load %arg4[%c0_62, %c0_63, %c0_64, %c0_65] : memref<1x8x16x4xbf16, #tpu.memory_space<vmem>>, vector<1x8x16x4xbf16>
    tpu.vector_store %arg4[%c0_62, %c0_63, %c0_64, %c0_65], %70 {strides = array<i32>} : memref<1x8x16x4xbf16, #tpu.memory_space<vmem>>, vector<1x8x16x4xbf16>,
    %cst_66 = arith.constant dense<0.000000e+00> : vector<4xf32>
    %72 = vector.multi_reduction <add>, %68, %cst_66 [0] : vector<128x4xf32> to vector<4xf32>
    %73 = vector.shape_cast %72 : vector<4xf32> to vector<1x4xf32>
    %74 = arith.mulf %68, %68 : vector<128x4xf32>
    %cst_67 = arith.constant dense<0.000000e+00> : vector<4xf32>
    %75 = vector.multi_reduction <add>, %74, %cst_67 [0] : vector<128x4xf32> to vector<4xf32>
    %76 = vector.shape_cast %75 : vector<4xf32> to vector<1x4xf32>
    %77 = tpu.concatenate %73, %76 in 0 : vector<1x4xf32>, vector<1x4xf32> -> vector<2x4xf32>
    %78 = vector.shape_cast %77 : vector<2x4xf32> to vector<1x1x2x4xf32>
    %c0_68 = arith.constant 0 : index
    %c0_69 = arith.constant 0 : index
    %c0_70 = arith.constant 0 : index
    %c0_71 = arith.constant 0 : index
    %79 = vector.load %arg5[%c0_68, %c0_69, %c0_70, %c0_71] : memref<1x1x2x4xf32, #tpu.memory_space<vmem>>, vector<1x1x2x4xf32>
    tpu.vector_store %arg5[%c0_68, %c0_69, %c0_70, %c0_71], %78 {strides = array<i32>} : memref<1x1x2x4xf32, #tpu.memory_space<vmem>>, vector<1x1x2x4xf32>,
    return
  }
  func.func @transform_0(%arg0: i32, %arg1: i32) -> (i32, i32, i32, i32) {
    %c0_i32 = arith.constant 0 : i32
    %c0_i32_0 = arith.constant 0 : i32
    %c0_i32_1 = arith.constant 0 : i32
    %c0_i32_2 = arith.constant 0 : i32
    return %arg0, %c0_i32, %c0_i32_0, %c0_i32_1 : i32, i32, i32, i32
  }
  func.func @transform_1(%arg0: i32, %arg1: i32) -> (i32, i32) {
    %c0_i32 = arith.constant 0 : i32
    %c0_i32_0 = arith.constant 0 : i32
    %c0_i32_1 = arith.constant 0 : i32
    return %c0_i32, %c0_i32_0 : i32, i32
  }
  func.func @transform_2(%arg0: i32, %arg1: i32) -> (i32, i32, i32, i32) {
    %c0_i32 = arith.constant 0 : i32
    %c0_i32_0 = arith.constant 0 : i32
    %c0_i32_1 = arith.constant 0 : i32
    return %arg0, %arg1, %c0_i32, %c0_i32_0 : i32, i32, i32, i32
  }
  func.func @transform_3(%arg0: i32, %arg1: i32) -> (i32, i32, i32, i32) {
    %c0_i32 = arith.constant 0 : i32
    %c0_i32_0 = arith.constant 0 : i32
    %c0_i32_1 = arith.constant 0 : i32
    return %arg0, %arg1, %c0_i32, %c0_i32_0 : i32, i32, i32, i32
  }
}

</mosaic_0001>

<bundles_post_ra>
// kernel: tpu_custom_call.1
= control target key start
LH: loop header
LB: loop body
LE: loop exit
PB: predicated region body
PF: predicated region fallthrough
CT: control target
= control target key end

     0   :  { %9 = vsyncpa [#allocation4], 0  ;;  %s5555_s0 = inlined_call_operand.vmem [shape: f32[2,16,16,4], index: 0, kind: input, shape index: {}]   ;;  %s5556_s1 = inlined_call_operand.vmem [shape: bf16[36,4], index: 1, kind: input, shape index: {}]   ;;  %s5557_s2 = inlined_call_operand.vmem [shape: bf16[2,16,16,4], index: 2, kind: output, shape index: {0}]   ;;  %s5558_s3 = inlined_call_operand.hbm [shape: f32[2,2,2,4], index: 3, kind: output, shape index: {1}]  }
   0x1   :  { %11 = vsyncpa [#allocation4 + $0x1], 0  ;;  %s4209_s12 = smov 0   ;;  %s4211_s13 = smov 0  }
   0x2   :  { %s4213_s14 = smov 0   ;;  %s4215_s15 = smov 0  }
   0x3   :  { %s4217_s16 = smov 0   ;;  %s4219_s17 = smov 0  }
   0x4   :  { %s4221_s18 = smov 0   ;;  %s4223_s19 = smov 0  }
   0x5 LB: > { %s3460_s20 = sadd.s32 4294967295, %s4184_s19   ;;  %s3461_s21 = sadd.s32 4294967294, %s4184_s19   ;;  %s4184_s19 = sphi %s4223_s19, %s17_s19   ;;  %s4180_s18 = sphi %s4221_s18, %s5620_s18   ;;  %s4176_s17 = sphi %s4219_s17, %s5619_s17   ;;  %s4172_s16 = sphi %s4217_s16, %s5618_s16   ;;  %s4168_s15 = sphi %s4215_s15, %s5617_s15   ;;  %s4164_s14 = sphi %s4213_s14, %s5616_s14   ;;  %s4160_s13 = sphi %s4211_s13, %s5615_s13   ;;  %s4156_s12 = sphi %s4209_s12, %s5614_s12  }
   0x6   : > { %s26_s22 = sadd.s32 1, %s4176_s17  ;;  %s29_s23 = sadd.s32 1, %s4180_s18 }
   0x7   : > { %p27_p0 = scmp.ge.s32.totalorder %s26_s22, 2  ;;  %p123_p1 = scmp.ne.s32.totalorder %s4164_s14, %s4160_s13 }
   0x8   : > { %p124_p2 = scmp.eq.s32.totalorder %s3460_s20, 3  ;;  %p129_p5 = scmp.ne.s32.totalorder %s4160_s13, %s4156_s12 }
   0x9   : > { %s5622_s22 = smov (%p27_p0, %s26_s22), 0  ;;  %s5624_s23 = smov (!%p27_p0, %s29_s23), %s4180_s18 }
   0xa   : > { %s109_s24 = ssub.s32 %s4176_s17, %s5622_s22  ;;  %p4260_p3 = por %p124_p2, %p123_p1 }
   0xb   : > { %p31_p4 = scmp.ge.s32.totalorder %s5624_s23, 2  ;;  %p130_p6 = scmp.eq.s32.totalorder %s3461_s21, 3 }
   0xc   : > { %p3464_p7 = scmp.ge.s32.totalorder %s4184_s19, 1  ;;  %p159_p9 = scmp.lt.s32.totalorder %s4184_s19, 5 }
   0xd   : > { %s5626_s23 = smov (%p31_p4, %s5624_s23), 0  ;;  %p4269_p8 = por %p130_p6, %p129_p5 }
   0xe   : > { %5562 = sst [smem:[#allocation6_spill]] %s5626_s23  ;;  %s108_s27 = ssub.s32 %s4180_s18, %s5626_s23 }
   0xf   : > { %s113_s28 = sadd.s32 1, %s4164_s14  ;;  %s110_s29 = sor.u32 %s109_s24, %s108_s27 }
  0x10   : > { %p160_p10 = pnand %p3464_p7, %p159_p9  ;;  %p111_p11 = scmp.eq.s32.totalorder %s110_s29, 0 }
  0x12   : > { %s4278_s30 = scalar_select %p111_p11, %s4164_s14, %s113_s28  }
  0x13   : > { %163 = sbr.rel (%p160_p10) target bundleno = 545 (0x221), region = 28 }
  0x18   : > { %vm211_vm0 = vcmask 24576   ;;  %vm212_vm1 = vsmask.f32 256  ;;  %v217_v0 = vld [vmem:[#allocation2 + $0xc] sm:$0x1]  ;;  %s5559_s4 = sand.u32 1, %s4160_s13  }
  0x19   : > { %vm4283_vm2 = vmand %vm211_vm0, %vm212_vm1  ;;  %v220_v2 = vld [vmem:[#allocation2 + $0x18] sm:$0x1]  ;;  %v223_v3 = vld [vmem:[#allocation2 + $0x24] sm:$0x1]  ;;  %vm244_vm3 = vsmask.f32 7938 }
  0x1a   : > { %v218_v4 = vsel %vm4283_vm2, 0, %v217_v0  ;;  %v221_v5 = vsel %vm4283_vm2, 0, %v220_v2  ;;  %v224_v6 = vsel %vm4283_vm2, 0, %v223_v3  ;;  %v226_v7 = vld [vmem:[#allocation2 + $0x30] sm:$0x1]  ;;  %s4295_s5 = sshll.u32 %s5559_s4, 1  ;;  %vm4301_vm4 = vmand %vm211_vm0, %vm244_vm3 }
  0x1b   : > { %219 = vst [vmem:[#allocation2 + $0xc] sm:$0x1] %v218_v4  ;;  %222 = vst [vmem:[#allocation2 + $0x18] sm:$0x1] %v221_v5  ;;  %v227_v8 = vsel %vm4283_vm2, 0, %v226_v7  ;;  %p193_p12 = scmp.lt.s32.totalorder %s4172_s16, 1 }
  0x1c   : > { %225 = vst [vmem:[#allocation2 + $0x24] sm:$0x1] %v224_v6  ;;  %v229_v9 = vld [vmem:[#allocation2 + $0x3c] sm:$0x1]  ;;  %v232_v10 = vld [vmem:[#allocation2 + $0x48] sm:$0x1] }
  0x1d   : > { %228 = vst [vmem:[#allocation2 + $0x30] sm:$0x1] %v227_v8  ;;  %v230_v12 = vsel %vm4283_vm2, 0, %v229_v9  ;;  %v233_v13 = vsel %vm4283_vm2, 0, %v232_v10  ;;  %v235_v14 = vld [vmem:[#allocation2 + $0x54] sm:$0x1] }
  0x1e   : > { %v238_v15 = vld [vmem:[#allocation2 + $0x60] sm:$0x1]  ;;  %231 = vst [vmem:[#allocation2 + $0x3c] sm:$0x1] %v230_v12  ;;  %234 = vst [vmem:[#allocation2 + $0x48] sm:$0x1] %v233_v13 }
  0x1f   : > { %v236_v16 = vsel %vm4283_vm2, 0, %v235_v14  ;;  %v239_v17 = vsel %vm4283_vm2, 0, %v238_v15  ;;  %v249_v18 = vld [vmem:[#allocation2 + $0x14] sm:$0x1]  ;;  %v252_v19 = vld [vmem:[#allocation2 + $0x20] sm:$0x1] }
  0x20   : > { %237 = vst [vmem:[#allocation2 + $0x54] sm:$0x1] %v236_v16  ;;  %240 = vst [vmem:[#allocation2 + $0x60] sm:$0x1] %v239_v17  ;;  %v250_v20 = vsel %vm4301_vm4, 0, %v249_v18  ;;  %v253_v21 = vsel %vm4301_vm4, 0, %v252_v19 }
  0x21   : > { %v255_v22 = vld [vmem:[#allocation2 + $0x2c] sm:$0x1]  ;;  %v258_v23 = vld [vmem:[#allocation2 + $0x38] sm:$0x1]  ;;  %251 = vst [vmem:[#allocation2 + $0x14] sm:$0x1] %v250_v20 }
  0x22   : > { %254 = vst [vmem:[#allocation2 + $0x20] sm:$0x1] %v253_v21  ;;  %v256_v24 = vsel %vm4301_vm4, 0, %v255_v22  ;;  %v259_v25 = vsel %vm4301_vm4, 0, %v258_v23  ;;  %v261_v26 = vld [vmem:[#allocation2 + $0x44] sm:$0x1] }
  0x23   : > { %v264_v27 = vld [vmem:[#allocation2 + $0x50] sm:$0x1]  ;;  %257 = vst [vmem:[#allocation2 + $0x2c] sm:$0x1] %v256_v24  ;;  %260 = vst [vmem:[#allocation2 + $0x38] sm:$0x1] %v259_v25 }
  0x24   : > { %v262_v28 = vsel %vm4301_vm4, 0, %v261_v26  ;;  %v265_v29 = vsel %vm4301_vm4, 0, %v264_v27  ;;  %v267_v30 = vld [vmem:[#allocation2 + $0x5c] sm:$0x1]  ;;  %v270_v31 = vld [vmem:[#allocation2 + $0x68] sm:$0x1] }
  0x25   : > { %263 = vst [vmem:[#allocation2 + $0x44] sm:$0x1] %v262_v28  ;;  %266 = vst [vmem:[#allocation2 + $0x50] sm:$0x1] %v265_v29  ;;  %v268_v32 = vsel %vm4301_vm4, 0, %v267_v30  ;;  %v271_v33 = vsel %vm4301_vm4, 0, %v270_v31 }
  0x26   : > { %v214_v34 = vld [vmem:[#allocation2] sm:$0x1]  ;;  %v241_v35 = vld [vmem:[#allocation2 + $0x6c] sm:$0x1]  ;;  %269 = vst [vmem:[#allocation2 + $0x5c] sm:$0x1] %v268_v32 }
  0x27   : > { %272 = vst [vmem:[#allocation2 + $0x68] sm:$0x1] %v271_v33  ;;  %v215_v36 = vsel %vm4283_vm2, 0, %v214_v34  ;;  %v242_v37 = vsel %vm4283_vm2, 0, %v241_v35  ;;  %v246_v38 = vld [vmem:[#allocation2 + $0x8] sm:$0x1] }
  0x28   : > { %v273_v39 = vld [vmem:[#allocation2 + $0x74] sm:$0x1]  ;;  %216 = vst [vmem:[#allocation2] sm:$0x1] %v215_v36  ;;  %243 = vst [vmem:[#allocation2 + $0x6c] sm:$0x1] %v242_v37 }
  0x29   : > { %v247_v40 = vsel %vm4301_vm4, 0, %v246_v38  ;;  %v274_v41 = vsel %vm4301_vm4, 0, %v273_v39  ;;  %s4339_s6 = sshll.u32 %s4168_s15, 3  ;;  %s3698_s7 = sshll.u32 %s4168_s15, 7  ;;  %vm505_vm5 = vcmask 27648  }
  0x2a   : > { %248 = vst [vmem:[#allocation2 + $0x8] sm:$0x1] %v247_v40  ;;  %275 = vst [vmem:[#allocation2 + $0x74] sm:$0x1] %v274_v41  ;;  %p201_p13 = scmp.lt.s32.totalorder %s4339_s6, 15  ;;  %s192_s23 = scalar_lea.vmem [#allocation3], %s4295_s5 }
  0x2b   : > { %s194_s8 = scalar_select %p193_p12, %s4172_s16, 1  ;;  %vm342_vm6 = vsmask.f32 4368  ;;  %vm4366_vm7 = vmand %vm505_vm5, %vm244_vm3  ;;  %v507_v0 = vld [vmem:[#allocation2 + $0xc] sm:$0xf] }
  0x2c   : > { %s202_s9 = scalar_select %p201_p13, %s4339_s6, 15  ;;  %vm4372_vm8 = vmor %vm212_vm1, %vm342_vm6  ;;  %v512_v6 = vld [vmem:[#allocation2 + $0x14] sm:$0x1]  ;;  %v515_v15 = vld [vmem:[#allocation2 + $0x18] sm:$0xf] }
  0x2d   : > { %s3697_s10 = sshll.u32 %s194_s8, 8  ;;  %s3470_s11 = sshll.u32 %s194_s8, 5  ;;  %v519_v16 = vld [vmem:[#allocation2 + $0x20] sm:$0x1]  ;;  %v522_v32 = vld [vmem:[#allocation2 + $0x24] sm:$0xf] }
  0x2e   : > { %s4348_s24 = scalar_lea.vmem %s5555_s0, %s3697_s10  ;;  %s3469_s27 = sshll.u32 %s202_s9, 1  ;;  %v526_v36 = vld [vmem:[#allocation2 + $0x2c] sm:$0x1] }
  0x2f   : > { %s205_s28 = sadd.s32 %s3470_s11, %s3469_s27  ;;  %s4351_s29 = scalar_lea.vmem %s4348_s24, %s3698_s7 }
  0x30   : > { %s3471_s4 = sshll.u32 %s205_s28, 2  ;;  %v278_v42 = vld [vmem:[%s4351_s29] sm:$0xff]  ;;  %v279_v43 = vld [vmem:[%s4351_s29 + $0x8] sm:$0xff]  ;;  %v280_v44 = vld [vmem:[%s4351_s29 + $0x10] sm:$0xff]  ;;  %p3490_p0 = scmp.ne.s32.totalorder %s4168_s15, 0 }
  0x31   : > { %s4359_s10 = scalar_lea.vmem %s5557_s2, %s3471_s4  ;;  %v3699_v45 = vpack.c.bf16 %v278_v42, %v278_v42  ;;  %v3700_v46 = vpack.c.bf16 %v279_v43, %v279_v43  ;;  %v3701_v47 = vpack.c.bf16 %v280_v44, %v280_v44  ;;  %v281_v48 = vld [vmem:[%s4351_s29 + $0x18] sm:$0xff]  ;;  %v282_v49 = vld [vmem:[%s4351_s29 + $0x20] sm:$0xff]  ;;  %v283_v50 = vld [vmem:[%s4351_s29 + $0x28] sm:$0xff] }
  0x32   : > { %v3702_v51 = vpack.c.bf16 %v281_v48, %v281_v48  ;;  %v3703_v52 = vpack.c.bf16 %v282_v49, %v282_v49  ;;  %v3704_v53 = vpack.c.bf16 %v283_v50, %v283_v50  ;;  %v284_v21 = vld [vmem:[%s4351_s29 + $0x30] sm:$0xff]  ;;  %v285_v22 = vld [vmem:[%s4351_s29 + $0x38] sm:$0xff]  ;;  %v286_v27 = vld [vmem:[%s4351_s29 + $0x40] sm:$0xff] }
  0x33   : > { %v345_v54 = vshrl.u32 %v3699_v45, 16  ;;  %v348_v55 = vshll.u32 %v3699_v45, 16  ;;  %v353_v56 = vshrl.u32 %v3700_v46, 16  ;;  %v356_v57 = vshll.u32 %v3700_v46, 16  ;;  %v287_v28 = vld [vmem:[%s4351_s29 + $0x48] sm:$0xff]  ;;  %v289_v48 = vld [vmem:[%s4351_s29 + $0x58] sm:$0xff] }
  0x34   : > { %v362_v58 = vshrl.u32 %v3701_v47, 16  ;;  %v365_v59 = vshll.u32 %v3701_v47, 16  ;;  %v370_v60 = vshrl.u32 %v3702_v51, 16  ;;  %v373_v61 = vshll.u32 %v3702_v51, 16  ;;  %v288_v47 = vld [vmem:[%s4351_s29 + $0x50] sm:$0xff] }
  0x35   : > { %v347_v62 = vrot.slane %v345_v54, 7  ;;  %v355_v2 = vrot.slane %v353_v56, 7  ;;  %v379_v3 = vshrl.u32 %v3703_v52, 16  ;;  %v382_v4 = vshll.u32 %v3703_v52, 16 }
  0x36   : > { %v364_v7 = vrot.slane %v362_v58, 7  ;;  %v372_v8 = vrot.slane %v370_v60, 7  ;;  %v387_v9 = vshrl.u32 %v3704_v53, 16  ;;  %v390_v10 = vshll.u32 %v3704_v53, 16  ;;  %v533_v58 = vld [vmem:[#allocation2 + $0x38] sm:$0x1] }
  0x37   : > { %v350_v11 = vor.u32 %v348_v55, %v347_v62  ;;  %v351_v12 = vrot.slane %v347_v62, 4  ;;  %v358_v13 = vor.u32 %v356_v57, %v355_v2  ;;  %v360_v14 = vrot.slane %v355_v2, 4  ;;  %v529_v57 = vld [vmem:[#allocation2 + $0x30] sm:$0xf] }
  0x38   : > { %v367_v17 = vor.u32 %v365_v59, %v364_v7  ;;  %v368_v18 = vrot.slane %v364_v7, 4  ;;  %v375_v19 = vor.u32 %v373_v61, %v372_v8  ;;  %v377_v20 = vrot.slane %v372_v8, 4 }
  0x39   : > { %v508_v23 = vsel %vm4366_vm7, %v350_v11, %v507_v0  ;;  %v359_v24 = vsel %vm4372_vm8, %v351_v12, %v358_v13  ;;  %v513_v25 = vsel %vm4283_vm2, %v360_v14, %v512_v6  ;;  %v381_v26 = vrot.slane %v379_v3, 7  ;;  %v536_v6 = vld [vmem:[#allocation2 + $0x3c] sm:$0xf]  ;;  %v290_v11 = vld [vmem:[%s4351_s29 + $0x60] sm:$0xff]  ;;  %v291_v12 = vld [vmem:[%s4351_s29 + $0x68] sm:$0xff] }
  0x3a   : > { %509 = vst [vmem:[#allocation2 + $0xc] sm:$0xf] %v508_v23  ;;  %511 = vst.msk [vmem:[#allocation2 + $0x10] sm:$0xf] %vm505_vm5, %v359_v24  ;;  %v516_v29 = vsel %vm4366_vm7, %v367_v17, %v515_v15  ;;  %v376_v30 = vsel %vm4372_vm8, %v368_v18, %v375_v19  ;;  %v520_v31 = vsel %vm4283_vm2, %v377_v20, %v519_v16  ;;  %v389_v33 = vrot.slane %v387_v9, 7 }
  0x3b   : > { %514 = vst [vmem:[#allocation2 + $0x14] sm:$0x1] %v513_v25  ;;  %517 = vst [vmem:[#allocation2 + $0x18] sm:$0xf] %v516_v29  ;;  %v384_v34 = vor.u32 %v382_v4, %v381_v26  ;;  %v385_v35 = vrot.slane %v381_v26, 4  ;;  %v3705_v37 = vpack.c.bf16 %v284_v21, %v284_v21  ;;  %v3706_v38 = vpack.c.bf16 %v285_v22, %v285_v22 }
  0x3c   : > { %518 = vst.msk [vmem:[#allocation2 + $0x1c] sm:$0xf] %vm505_vm5, %v376_v30  ;;  %521 = vst [vmem:[#allocation2 + $0x20] sm:$0x1] %v520_v31  ;;  %v392_v39 = vor.u32 %v390_v10, %v389_v33  ;;  %v394_v40 = vrot.slane %v389_v33, 4  ;;  %v3707_v41 = vpack.c.bf16 %v286_v27, %v286_v27  ;;  %v3708_v42 = vpack.c.bf16 %v287_v28, %v287_v28  ;;  %v292_v27 = vld [vmem:[%s4351_s29 + $0x70] sm:$0xff] }
  0x3d   : > { %v523_v43 = vsel %vm4366_vm7, %v384_v34, %v522_v32  ;;  %v396_v44 = vshrl.u32 %v3705_v37, 16  ;;  %v399_v45 = vshll.u32 %v3705_v37, 16  ;;  %v404_v46 = vshrl.u32 %v3706_v38, 16  ;;  %v540_v16 = vld [vmem:[#allocation2 + $0x44] sm:$0x1]  ;;  %v293_v28 = vld [vmem:[%s4351_s29 + $0x78] sm:$0xff] }
  0x3e   : > { %524 = vst [vmem:[#allocation2 + $0x24] sm:$0xf] %v523_v43  ;;  %v393_v49 = vsel %vm4372_vm8, %v385_v35, %v392_v39  ;;  %v527_v50 = vsel %vm4283_vm2, %v394_v40, %v526_v36  ;;  %v407_v51 = vshll.u32 %v3706_v38, 16  ;;  %v413_v52 = vshrl.u32 %v3707_v41, 16  ;;  %v543_v22 = vld [vmem:[#allocation2 + $0x48] sm:$0xf] }
  0x3f   : > { %525 = vst.msk [vmem:[#allocation2 + $0x28] sm:$0xf] %vm505_vm5, %v393_v49  ;;  %528 = vst [vmem:[#allocation2 + $0x2c] sm:$0x1] %v527_v50  ;;  %v398_v53 = vrot.slane %v396_v44, 7  ;;  %v406_v54 = vrot.slane %v404_v46, 7  ;;  %v3709_v61 = vpack.c.bf16 %v288_v47, %v288_v47  ;;  %v3710_v62 = vpack.c.bf16 %v289_v48, %v289_v48 }
  0x40   : > { %v416_v55 = vshll.u32 %v3707_v41, 16  ;;  %v421_v56 = vshrl.u32 %v3708_v42, 16  ;;  %v415_v59 = vrot.slane %v413_v52, 7  ;;  %v424_v60 = vshll.u32 %v3708_v42, 16  ;;  %v547_v38 = vld [vmem:[#allocation2 + $0x50] sm:$0x1] }
  0x41   : > { %v401_v0 = vor.u32 %v399_v45, %v398_v53  ;;  %v402_v2 = vrot.slane %v398_v53, 4  ;;  %v409_v3 = vor.u32 %v407_v51, %v406_v54  ;;  %v411_v4 = vrot.slane %v406_v54, 4  ;;  %v550_v46 = vld [vmem:[#allocation2 + $0x54] sm:$0xf] }
  0x42   : > { %v418_v7 = vor.u32 %v416_v55, %v415_v59  ;;  %v419_v8 = vrot.slane %v415_v59, 4  ;;  %v423_v9 = vrot.slane %v421_v56, 7  ;;  %v430_v10 = vshrl.u32 %v3709_v61, 16  ;;  %v554_v55 = vld [vmem:[#allocation2 + $0x5c] sm:$0x1] }
  0x43   : > { %v530_v13 = vsel %vm4366_vm7, %v401_v0, %v529_v57  ;;  %v410_v14 = vsel %vm4372_vm8, %v402_v2, %v409_v3  ;;  %v534_v15 = vsel %vm4283_vm2, %v411_v4, %v533_v58  ;;  %v433_v17 = vshll.u32 %v3709_v61, 16  ;;  %v557_v61 = vld [vmem:[#allocation2 + $0x60] sm:$0xf]  ;;  %v561_v4 = vld [vmem:[#allocation2 + $0x68] sm:$0x1] }
  0x44   : > { %531 = vst [vmem:[#allocation2 + $0x30] sm:$0xf] %v530_v13  ;;  %532 = vst.msk [vmem:[#allocation2 + $0x34] sm:$0xf] %vm505_vm5, %v410_v14  ;;  %v537_v18 = vsel %vm4366_vm7, %v418_v7, %v536_v6  ;;  %v426_v19 = vor.u32 %v424_v60, %v423_v9  ;;  %v428_v20 = vrot.slane %v423_v9, 4  ;;  %v432_v21 = vrot.slane %v430_v10, 7 }
  0x45   : > { %535 = vst [vmem:[#allocation2 + $0x38] sm:$0x1] %v534_v15  ;;  %538 = vst [vmem:[#allocation2 + $0x3c] sm:$0xf] %v537_v18  ;;  %v438_v23 = vshrl.u32 %v3710_v62, 16  ;;  %v441_v24 = vshll.u32 %v3710_v62, 16  ;;  %v3711_v25 = vpack.c.bf16 %v290_v11, %v290_v11  ;;  %v3712_v26 = vpack.c.bf16 %v291_v12, %v291_v12 }
  0x46   : > { %v427_v29 = vsel %vm4372_vm8, %v419_v8, %v426_v19  ;;  %v541_v30 = vsel %vm4283_vm2, %v428_v20, %v540_v16  ;;  %v435_v31 = vor.u32 %v433_v17, %v432_v21  ;;  %v436_v32 = vrot.slane %v432_v21, 4 }
  0x47   : > { %539 = vst.msk [vmem:[#allocation2 + $0x40] sm:$0xf] %vm505_vm5, %v427_v29  ;;  %542 = vst [vmem:[#allocation2 + $0x44] sm:$0x1] %v541_v30  ;;  %v440_v33 = vrot.slane %v438_v23, 7  ;;  %v447_v34 = vshrl.u32 %v3711_v25, 16  ;;  %v3713_v40 = vpack.c.bf16 %v292_v27, %v292_v27  ;;  %v3714_v41 = vpack.c.bf16 %v293_v28, %v293_v28 }
  0x48   : > { %v450_v35 = vshll.u32 %v3711_v25, 16  ;;  %v455_v36 = vshrl.u32 %v3712_v26, 16  ;;  %v544_v37 = vsel %vm4366_vm7, %v435_v31, %v543_v22  ;;  %v458_v39 = vshll.u32 %v3712_v26, 16 }
  0x49   : > { %545 = vst [vmem:[#allocation2 + $0x48] sm:$0xf] %v544_v37  ;;  %v443_v42 = vor.u32 %v441_v24, %v440_v33  ;;  %v445_v43 = vrot.slane %v440_v33, 4  ;;  %v449_v44 = vrot.slane %v447_v34, 7  ;;  %v464_v47 = vshrl.u32 %v3713_v40, 16 }
  0x4a   : > { %v457_v45 = vrot.slane %v455_v36, 7  ;;  %v467_v48 = vshll.u32 %v3713_v40, 16  ;;  %v472_v49 = vshrl.u32 %v3714_v41, 16  ;;  %v475_v50 = vshll.u32 %v3714_v41, 16 }
  0x4b   : > { %v444_v51 = vsel %vm4372_vm8, %v436_v32, %v443_v42  ;;  %v548_v52 = vsel %vm4283_vm2, %v445_v43, %v547_v38  ;;  %v452_v53 = vor.u32 %v450_v35, %v449_v44  ;;  %v453_v54 = vrot.slane %v449_v44, 4 }
  0x4c   : > { %546 = vst.msk [vmem:[#allocation2 + $0x4c] sm:$0xf] %vm505_vm5, %v444_v51  ;;  %549 = vst [vmem:[#allocation2 + $0x50] sm:$0x1] %v548_v52  ;;  %v460_v56 = vor.u32 %v458_v39, %v457_v45  ;;  %v462_v57 = vrot.slane %v457_v45, 4  ;;  %v466_v58 = vrot.slane %v464_v47, 7 }
  0x4d   : > { %v474_v59 = vrot.slane %v472_v49, 7  ;;  %v551_v60 = vsel %vm4366_vm7, %v452_v53, %v550_v46 }
  0x4e   : > { %552 = vst [vmem:[#allocation2 + $0x54] sm:$0xf] %v551_v60  ;;  %v461_v62 = vsel %vm4372_vm8, %v453_v54, %v460_v56  ;;  %v555_v0 = vsel %vm4283_vm2, %v462_v57, %v554_v55  ;;  %v469_v2 = vor.u32 %v467_v48, %v466_v58  ;;  %v470_v3 = vrot.slane %v466_v58, 4  ;;  %567 = sbr.rel (%p3490_p0) target bundleno = 86 (0x56), region = 32 }
  0x4f   : > { %553 = vst.msk [vmem:[#allocation2 + $0x58] sm:$0xf] %vm505_vm5, %v461_v62  ;;  %556 = vst [vmem:[#allocation2 + $0x5c] sm:$0x1] %v555_v0  ;;  %v477_v6 = vor.u32 %v475_v50, %v474_v59  ;;  %v479_v7 = vrot.slane %v474_v59, 4 }
  0x50   : > { %v558_v8 = vsel %vm4366_vm7, %v469_v2, %v557_v61 }
  0x51   : > { %559 = vst [vmem:[#allocation2 + $0x60] sm:$0xf] %v558_v8  ;;  %v478_v9 = vsel %vm4372_vm8, %v470_v3, %v477_v6  ;;  %v562_v10 = vsel %vm4283_vm2, %v479_v7, %v561_v4 }
  0x52   : > { %560 = vst.msk [vmem:[#allocation2 + $0x64] sm:$0xf] %vm505_vm5, %v478_v9  ;;  %563 = vst [vmem:[#allocation2 + $0x68] sm:$0x1] %v562_v10 }
  0x53   : > { %v568_v11 = vld [vmem:[#allocation2] sm:$0xf]  ;;  %v572_v12 = vld [vmem:[#allocation2 + $0x8] sm:$0x1]  ;;  %v4186_v14 = vmov 0  }
  0x54   : > { %v569_v13 = vsel %vm4366_vm7, 0, %v568_v11  ;;  %571 = vst.msk [vmem:[#allocation2 + $0x4] sm:$0xf] %vm505_vm5, %v4186_v14  ;;  %v573_v15 = vsel %vm4283_vm2, 0, %v572_v12 }
  0x55   : > { %570 = vst [vmem:[#allocation2] sm:$0xf] %v569_v13  ;;  %574 = vst [vmem:[#allocation2 + $0x8] sm:$0x1] %v573_v15 }
  0x56 PF: > { %p3491_p1 = scmp.le.s32.totalorder %s4168_s15, 0 }
  0x57   : > { %s3492_s4 = sadd.s32 (!%p3491_p1), 4294967295, %s4339_s6 }
  0x58   : > { %578 = sbr.rel (%p3491_p1) target bundleno = 105 (0x69), region = 36  ;;  %s3493_s7 = sshll.u32 (!%p3491_p1), %s3492_s4, 4 }
  0x59   : > { %s581_s9 = scalar_lea.vmem (!%p3491_p1), %s4348_s24, %s3493_s7 }
  0x5d   : > { %v582_v16 = vld [vmem:[%s581_s9] sm:$0xff]  ;;  %v583_v17 = vld [vmem:[%s581_s9 + $0x8] sm:$0xff] }
  0x5e   : > { %v3715_v18 = vpack.c.bf16 %v582_v16, %v582_v16  ;;  %v3716_v19 = vpack.c.bf16 %v583_v17, %v583_v17  ;;  %v610_v26 = vld [vmem:[#allocation2] sm:$0xf]  ;;  %v614_v27 = vld [vmem:[#allocation2 + $0x8] sm:$0x1] }
  0x60   : > { %v591_v20 = vshrl.u32 %v3715_v18, 16  ;;  %v594_v21 = vshll.u32 %v3715_v18, 16  ;;  %v599_v22 = vshrl.u32 %v3716_v19, 16  ;;  %v602_v23 = vshll.u32 %v3716_v19, 16 }
  0x62   : > { %v593_v24 = vrot.slane %v591_v20, 7  ;;  %v601_v25 = vrot.slane %v599_v22, 7 }
  0x64   : > { %v596_v28 = vor.u32 %v594_v21, %v593_v24  ;;  %v597_v29 = vrot.slane %v593_v24, 4  ;;  %v604_v30 = vor.u32 %v602_v23, %v601_v25  ;;  %v606_v31 = vrot.slane %v601_v25, 4 }
  0x66   : > { %v611_v32 = vsel %vm4366_vm7, %v596_v28, %v610_v26  ;;  %v605_v33 = vsel %vm4372_vm8, %v597_v29, %v604_v30  ;;  %v615_v34 = vsel %vm4283_vm2, %v606_v31, %v614_v27 }
  0x67   : > { %612 = vst [vmem:[#allocation2] sm:$0xf] %v611_v32  ;;  %613 = vst.msk [vmem:[#allocation2 + $0x4] sm:$0xf] %vm505_vm5, %v605_v33 }
  0x68   : > { %616 = vst [vmem:[#allocation2 + $0x8] sm:$0x1] %v615_v34 }
  0x69 PF: > { %p3496_p2 = scmp.ne.s32.totalorder %s4168_s15, 1 }
  0x6b   : > { %620 = sbr.rel (%p3496_p2) target bundleno = 115 (0x73), region = 40 }
  0x70   : > { %v622_v35 = vld [vmem:[#allocation2 + $0x6c] sm:$0xf]  ;;  %v626_v36 = vld [vmem:[#allocation2 + $0x74] sm:$0x1]  ;;  %v4187_v38 = vmov 0  }
  0x71   : > { %v623_v37 = vsel %vm4366_vm7, 0, %v622_v35  ;;  %625 = vst.msk [vmem:[#allocation2 + $0x70] sm:$0xf] %vm505_vm5, %v4187_v38  ;;  %v627_v39 = vsel %vm4283_vm2, 0, %v626_v36 }
  0x72   : > { %624 = vst [vmem:[#allocation2 + $0x6c] sm:$0xf] %v623_v37  ;;  %628 = vst [vmem:[#allocation2 + $0x74] sm:$0x1] %v627_v39 }
  0x73 PF: > { %p3497_p4 = scmp.ge.s32.totalorder %s4168_s15, 1 }
  0x75   : > { %632 = sbr.rel (%p3497_p4) target bundleno = 134 (0x86), region = 44 }
  0x7a   : > { %v3500_v40 = vld [vmem:[%s4351_s29 + $0x80] sm:$0xff]  ;;  %v3501_v41 = vld [vmem:[%s4351_s29 + $0x88] sm:$0xff]  ;;  %v669_v51 = vld [vmem:[#allocation2 + $0x74] sm:$0x1] }
  0x7b   : > { %v3718_v42 = vpack.c.bf16 %v3500_v40, %v3500_v40  ;;  %v3719_v43 = vpack.c.bf16 %v3501_v41, %v3501_v41  ;;  %v665_v50 = vld [vmem:[#allocation2 + $0x6c] sm:$0xf] }
  0x7d   : > { %v645_v44 = vshrl.u32 %v3718_v42, 16  ;;  %v648_v45 = vshll.u32 %v3718_v42, 16  ;;  %v653_v46 = vshrl.u32 %v3719_v43, 16  ;;  %v656_v47 = vshll.u32 %v3719_v43, 16 }
  0x7f   : > { %v647_v48 = vrot.slane %v645_v44, 7  ;;  %v655_v49 = vrot.slane %v653_v46, 7 }
  0x81   : > { %v650_v52 = vor.u32 %v648_v45, %v647_v48  ;;  %v651_v53 = vrot.slane %v647_v48, 4  ;;  %v658_v54 = vor.u32 %v656_v47, %v655_v49  ;;  %v660_v55 = vrot.slane %v655_v49, 4 }
  0x83   : > { %v666_v56 = vsel %vm4366_vm7, %v650_v52, %v665_v50  ;;  %v659_v57 = vsel %vm4372_vm8, %v651_v53, %v658_v54  ;;  %v670_v58 = vsel %vm4283_vm2, %v660_v55, %v669_v51 }
  0x84   : > { %667 = vst [vmem:[#allocation2 + $0x6c] sm:$0xf] %v666_v56  ;;  %668 = vst.msk [vmem:[#allocation2 + $0x70] sm:$0xf] %vm505_vm5, %v659_v57 }
  0x85   : > { %671 = vst [vmem:[#allocation2 + $0x74] sm:$0x1] %v670_v58 }
  0x86 PF: > { %v4064_v59 = vld [vmem:[%s5556_s1] ss:$0 sps:$4 sm:$0xcc]   ;;  %vm946_vm9 = vcmask 1041408   ;;  %v4480_v63 = vld [vmem:[#allocation2 + $0x4] sm:$0xf] }
  0x87   : > { %v4478_v60 = vld [vmem:[#allocation2] sm:$0xf]  ;;  %v4482_v61 = vld [vmem:[#allocation2 + $0x8] sm:$0x1]  ;;  %v920_v5 = vrot.slane %v4064_v59, 2  ;;  %v710_v0 = vshll.u32 %v4480_v63, 16 }
  0x88   : > { %vm697_vm10 = vsmask.f32 3328  ;;  %v701_v1 = vshrl.u32 %v4478_v60, 16  ;;  %v704_v62 = vshll.u32 %v4478_v60, 16  ;;  %v714_v2 = vshrl.u32 %v4480_v63, 16  ;;  %s3338_s8 = sshll.u32 %s192_s23, 4  ;;  %s3339_s8 = int_to_ptr.vmem [resolvable:$true] %s3338_s8 }
  0x89   : > { %v720_v3 = vshll.u32 %v4482_v61, 16  ;;  %v4489_v4 = vld [vmem:[#allocation2 + $0x30] sm:$0xf]  ;;  %3982 = vmatprep.subr.msk.bf16.mxu1 %vm946_vm9, %v920_v5  ;;  %3981 = vmatprep.subr.msk.bf16.mxu0 %vm946_vm9, %v920_v5  ;;  %v948_v6 = vsel %vm946_vm9, %v920_v5, 0  ;;  %vm698_vm11 = vsmask.f32 7440 }
  0x8a   : > { %v703_v7 = vrot.slane %v701_v1, 4  ;;  %v4494_v8 = vld [vmem:[#allocation2 + $0x34] sm:$0xf]  ;;  %3980 = vmatpush3.bf16.msra.mxu1 %v948_v6  ;;  %3818 = vmatpush3.bf16.msra.mxu0 %v948_v6  ;;  %v706_v9 = vrot.slane %v704_v62, 5  ;;  %v712_v10 = vrot.slane %v710_v0, 5  ;;  %v716_v11 = vrot.slane %v714_v2, 4  ;;  %vm4513_vm13 = vmor %vm697_vm10, %vm698_vm11 }
  0x8b   : > { %vm921_vm12 = vcmask 31744   ;;  %v4496_v12 = vld [vmem:[#allocation2 + $0x38] sm:$0x1]  ;;  %v797_v13 = vshrl.u32 %v4489_v4, 16  ;;  %v800_v14 = vshll.u32 %v4489_v4, 16  ;;  %v806_v15 = vshll.u32 %v4494_v8, 16 }
  0x8c   : > { %v810_v16 = vshrl.u32 %v4494_v8, 16  ;;  %v688_v17 = vld [vmem:[%s5556_s1] sm:$0x3]  ;;  %v707_v18 = vor.u32 %v706_v9, %v703_v7  ;;  %v717_v19 = vor.u32 %v716_v11, %v712_v10  ;;  %v722_v20 = vrot.slane %v720_v3, 5  ;;  %v4507_v22 = vld [vmem:[#allocation2 + $0xc] sm:$0xf] }
  0x8d   : > { %v816_v21 = vshll.u32 %v4496_v12, 16  ;;  %3983 = vmatprep.subr.msk.bf16.mxu1 %vm946_vm9, %v688_v17  ;;  %v4509_v23 = vld [vmem:[#allocation2 + $0x10] sm:$0xf]  ;;  %v799_v25 = vrot.slane %v797_v13, 4  ;;  %v802_v26 = vrot.slane %v800_v14, 5  ;;  %v808_v27 = vrot.slane %v806_v15, 5 }
  0x8e   : > { %v812_v28 = vrot.slane %v810_v16, 4  ;;  %v708_v29 = vrot.slane %v707_v18, 4  ;;  %v718_v30 = vrot.slane %v717_v19, 4  ;;  %v725_v32 = vshrl.u32 %v4507_v22, 16  ;;  %v4518_v35 = vld [vmem:[#allocation2 + $0x14] sm:$0x1] }
  0x8f   : > { %v818_v31 = vrot.slane %v816_v21, 5  ;;  %v803_v33 = vor.u32 %v802_v26, %v799_v25  ;;  %v728_v36 = vshll.u32 %v4507_v22, 16  ;;  %v734_v37 = vshll.u32 %v4509_v23, 16  ;;  %v1294_v42 = vld [vmem:[%s5556_s1 + $0x4] sm:$0x3]  ;;  %s4092_s6 = scalar_lea.vmem %s3339_s8, 32 }
  0x90   : > { %v813_v34 = vor.u32 %v812_v28, %v808_v27  ;;  %v713_v38 = vsel %vm4513_vm13, %v708_v29, %v712_v10  ;;  %v723_v39 = vsel %vm4513_vm13, %v718_v30, %v722_v20  ;;  %v727_v40 = vrot.slane %v725_v32, 4  ;;  %v4530_v47 = vld [vmem:[#allocation2 + $0x3c] sm:$0xf]  ;;  %3984 = vmatprep.subr.msk.bf16.mxu0 %vm946_vm9, %v1294_v42  ;;  %v4535_v52 = vld [vmem:[#allocation2 + $0x40] sm:$0xf]  ;;  %p4093_p5 = scmp.ne.s32.totalorder %s3339_s8, %s4092_s6  ;;  %s4188_s11 = smov [#allocation3]  }
  0x91   : > { %v738_v41 = vshrl.u32 %v4509_v23, 16  ;;  %v3504_v43 = vcombine.low %v713_v38, %v723_v39  ;;  %v804_v44 = vrot.slane %v803_v33, 4  ;;  %v730_v46 = vrot.slane %v728_v36, 5  ;;  %v4543_v57 = vld [vmem:[#allocation2 + $0x44] sm:$0x1]  ;;  %s4096_s20 = sshll.u32 %s4188_s11, 4  ;;  %s4097_s20 = int_to_ptr.vmem [resolvable:$false] %s4096_s20 }
  0x92   : > { %v814_v45 = vrot.slane %v813_v34, 4  ;;  %v1243_v48 = vrot.slane %v4482_v61, 5  ;;  %v736_v49 = vrot.slane %v734_v37, 5  ;;  %v744_v51 = vshll.u32 %v4518_v35, 16  ;;  %v4549_v6 = vld [vmem:[#allocation2 + $0x18] sm:$0xf]  ;;  %p4094_p6 = pnand %p4093_p5, %p4260_p3  ;;  %p4099_p9 = scmp.lt.s32.totalorder %s3339_s8, %s4097_s20 }
  0x93   : > { %v740_v50 = vrot.slane %v738_v41, 4  ;;  %3819 = vmatprep.mubr.msk.bf16.mxu0 %vm921_vm12, %v3504_v43  ;;  %v809_v53 = vsel %vm4513_vm13, %v804_v44, %v808_v27  ;;  %v731_v55 = vor.u32 %v730_v46, %v727_v40  ;;  %v1247_v56 = vrot.slane %v4509_v23, 5  ;;  %v4554_v13 = vld [vmem:[#allocation2 + $0x1c] sm:$0xf]  ;;  %v4558_v19 = vld [vmem:[#allocation2 + $0x20] sm:$0x1] }
  0x94   : > { %v819_v54 = vsel %vm4513_vm13, %v814_v45, %v818_v31  ;;  %v746_v5 = vrot.slane %v744_v51, 5  ;;  %v821_v1 = vshrl.u32 %v4530_v47, 16  ;;  %v824_v0 = vshll.u32 %v4530_v47, 16  ;;  %v4564_v27 = vld [vmem:[#allocation2 + $0x48] sm:$0xf]  ;;  %p4095_p7 = pneg %p4094_p6  ;;  %s4098_s21 = scalar_lea.vmem %s4097_s20, 64 }
  0x95   : > { %v3508_v58 = vcombine.low %v809_v53, %v819_v54  ;;  %v741_v59 = vor.u32 %v740_v50, %v736_v49  ;;  %v732_v62 = vrot.slane %v731_v55, 4  ;;  %v830_v2 = vshll.u32 %v4535_v52, 16  ;;  %v4567_v31 = vld [vmem:[#allocation2 + $0x4c] sm:$0xf]  ;;  %v4572_v37 = vld [vmem:[#allocation2 + $0x50] sm:$0x1]  ;;  %p4100_p10 = scmp.lt.s32.totalorder %s4098_s21, %s4092_s6 }
  0x96   : > { %v834_v3 = vshrl.u32 %v4535_v52, 16  ;;  %v823_v9 = vrot.slane %v821_v1, 4  ;;  %v840_v10 = vshll.u32 %v4543_v57, 16  ;;  %v1112_v11 = vsel %vm946_vm9, %v688_v17, 0 }
  0x97   : > { %3827 = vmatprep.mubr.msk.bf16.mxu1 %vm921_vm12, %v3508_v58  ;;  %v742_v7 = vrot.slane %v741_v59, 4  ;;  %v737_v14 = vsel %vm4513_vm13, %v732_v62, %v736_v49  ;;  %v826_v15 = vrot.slane %v824_v0, 5  ;;  %v832_v16 = vrot.slane %v830_v2, 5  ;;  %v4582_v49 = vld [vmem:[%s5556_s1 + $0x8] sm:$0x3]  ;;  %p4101_p11 = por %p4100_p10, %p4099_p9 }
  0x98   : > { %v836_v18 = vrot.slane %v834_v3, 4  ;;  %v842_v21 = vrot.slane %v840_v10, 5  ;;  %v1344_v25 = vsel %vm946_vm9, %v1294_v42, 0  ;;  %v749_v26 = vshrl.u32 %v4549_v6, 16  ;;  %v4576_v42 = vld [vmem:[#allocation2 + $0x24] sm:$0xf] }
  0x99   : > { %v747_v20 = vsel %vm4513_vm13, %v742_v7, %v746_v5  ;;  %v827_v28 = vor.u32 %v826_v15, %v823_v9  ;;  %v752_v30 = vshll.u32 %v4549_v6, 16  ;;  %v758_v33 = vshll.u32 %v4554_v13, 16  ;;  %v4593_v2 = vld [vmem:[#allocation2 + $0x28] sm:$0xf]  ;;  %p4102_p12 = pnand %p4101_p11, %p4095_p7 }
  0x9a   : > { %v3505_v17 = vcombine.low %v737_v14, %v747_v20  ;;  %v837_v29 = vor.u32 %v836_v18, %v832_v16  ;;  %v751_v32 = vrot.slane %v749_v26, 4  ;;  %v762_v34 = vshrl.u32 %v4554_v13, 16  ;;  %v4597_v14 = vld [vmem:[#allocation2 + $0x2c] sm:$0x1] }
  0x9b   : > { %v768_v36 = vshll.u32 %v4558_v19, 16  ;;  %v828_v38 = vrot.slane %v827_v28, 4  ;;  %v754_v40 = vrot.slane %v752_v30, 5  ;;  %v845_v41 = vshrl.u32 %v4564_v27, 16 }
  0x9c   : > { %3820 = vmatmul.mubr.msk.bf16.vlgmr.msra.gmra.mxu0 %vm921_vm12, %v3505_v17  ;;  %v838_v39 = vrot.slane %v837_v29, 4  ;;  %v760_v43 = vrot.slane %v758_v33, 5  ;;  %v764_v44 = vrot.slane %v762_v34, 4  ;;  %v848_v46 = vshll.u32 %v4564_v27, 16  ;;  %v4609_v34 = vld [vmem:[#allocation2 + $0x58] sm:$0xf] }
  0x9d   : > { %3854 = vmatpush3.bf16.msra.mxu0 %v1344_v25  ;;  %v770_v45 = vrot.slane %v768_v36, 5  ;;  %v833_v50 = vsel %vm4513_vm13, %v828_v38, %v832_v16  ;;  %v755_v53 = vor.u32 %v754_v40, %v751_v32  ;;  %v847_v54 = vrot.slane %v845_v41, 4  ;;  %v4602_v25 = vld [vmem:[#allocation2 + $0x54] sm:$0xf]  ;;  %v4613_v40 = vld [vmem:[#allocation2 + $0x5c] sm:$0x1] }
  0x9e   : > { %v843_v51 = vsel %vm4513_vm13, %v838_v39, %v842_v21  ;;  %3986 = vmatprep.subr.msk.bf16.mxu0 %vm946_vm9, %v4582_v49  ;;  %v765_v58 = vor.u32 %v764_v44, %v760_v43  ;;  %v850_v59 = vrot.slane %v848_v46, 5  ;;  %v854_v5 = vshll.u32 %v4567_v31, 16 }
  0x9f   : > { %v3509_v55 = vcombine.low %v833_v50, %v843_v51  ;;  %v756_v1 = vrot.slane %v755_v53, 4  ;;  %v858_v62 = vshrl.u32 %v4567_v31, 16  ;;  %v864_v0 = vshll.u32 %v4572_v37, 16  ;;  %v1211_v50 = vld [vmem:[#allocation2] sm:$0xe] }
  0xa0   : > { %v773_v3 = vshrl.u32 %v4576_v42, 16  ;;  %v766_v7 = vrot.slane %v765_v58, 4  ;;  %v851_v9 = vor.u32 %v850_v59, %v847_v54  ;;  %v856_v10 = vrot.slane %v854_v5, 5 }
  0xa1   : > { %3828 = vmatmul.mubr.msk.bf16.vlgmr.msra.gmra.mxu1 %vm921_vm12, %v3509_v55  ;;  %v776_v15 = vshll.u32 %v4576_v42, 16  ;;  %v761_v16 = vsel %vm4513_vm13, %v756_v1, %v760_v43  ;;  %v860_v18 = vrot.slane %v858_v62, 4  ;;  %v866_v20 = vrot.slane %v864_v0, 5  ;;  %v4066_v62 = vld [vmem:[%s5556_s1 + $0x4] ss:$0 sps:$4 sm:$0xcc]  }
  0xa2   : > { %3836 = vmatpush3.bf16.msra.mxu1 %v1112_v11  ;;  %v775_v21 = vrot.slane %v773_v3, 4  ;;  %v771_v26 = vsel %vm4513_vm13, %v766_v7, %v770_v45  ;;  %v852_v17 = vrot.slane %v851_v9, 4  ;;  %v782_v29 = vshll.u32 %v4593_v2, 16 }
  0xa3   : > { %v778_v28 = vrot.slane %v776_v15, 5  ;;  %v3506_v30 = vcombine.low %v761_v16, %v771_v26  ;;  %v861_v32 = vor.u32 %v860_v18, %v856_v10  ;;  %v786_v33 = vshrl.u32 %v4593_v2, 16 }
  0xa4   : > { %v792_v11 = vshll.u32 %v4597_v14, 16  ;;  %v857_v36 = vsel %vm4513_vm13, %v852_v17, %v856_v10  ;;  %v784_v39 = vrot.slane %v782_v29, 5  ;;  %v869_v41 = vshrl.u32 %v4602_v25, 16 }
  0xa5   : > { %v779_v38 = vor.u32 %v778_v28, %v775_v21  ;;  %3823 = vmatprep.mubr.msk.bf16.mxu0 %vm921_vm12, %v3506_v30  ;;  %v862_v43 = vrot.slane %v861_v32, 4  ;;  %v788_v44 = vrot.slane %v786_v33, 4  ;;  %v872_v46 = vshll.u32 %v4602_v25, 16 }
  0xa6   : > { %v794_v45 = vrot.slane %v792_v11, 5  ;;  %v871_v53 = vrot.slane %v869_v41, 4  ;;  %v878_v54 = vshll.u32 %v4609_v34, 16  ;;  %v882_v55 = vshrl.u32 %v4609_v34, 16 }
  0xa7   : > { %v780_v51 = vrot.slane %v779_v38, 4  ;;  %v867_v58 = vsel %vm4513_vm13, %v862_v43, %v866_v20  ;;  %v789_v59 = vor.u32 %v788_v44, %v784_v39  ;;  %v874_v5 = vrot.slane %v872_v46, 5  ;;  %v1212_v20 = vld [vmem:[#allocation2 + $0xc] sm:$0xe]  ;;  %v1213_v44 = vld [vmem:[#allocation2 + $0x18] sm:$0xe] }
  0xa8   : > { %v888_v1 = vshll.u32 %v4613_v40, 16  ;;  %v1250_v0 = vrot.slane %v4518_v35, 5  ;;  %v3510_v3 = vcombine.low %v857_v36, %v867_v58  ;;  %v880_v7 = vrot.slane %v878_v54, 5  ;;  %v1214_v46 = vld [vmem:[#allocation2 + $0x24] sm:$0xe] }
  0xa9   : > { %v884_v9 = vrot.slane %v882_v55, 4  ;;  %v785_v10 = vsel %vm4513_vm13, %v780_v51, %v784_v39  ;;  %v790_v15 = vrot.slane %v789_v59, 4  ;;  %v875_v16 = vor.u32 %v874_v5, %v871_v53  ;;  %v1215_v55 = vld [vmem:[#allocation2 + $0x30] sm:$0xe] }
  0xaa   : > { %v890_v18 = vrot.slane %v888_v1, 5  ;;  %3831 = vmatprep.mubr.msk.bf16.mxu1 %vm921_vm12, %v3510_v3  ;;  %vm1235_vm14 = vcmask 1042432   ;;  %vm1236_vm15 = vcmask 1046532   ;;  %v3537_v26 = vrot.slane %v1211_v50, 9  ;;  %v1216_v3 = vld [vmem:[#allocation2 + $0x3c] sm:$0xe] }
  0xab   : > { %v885_v21 = vor.u32 %v884_v9, %v880_v7  ;;  %v795_v17 = vsel %vm4513_vm13, %v790_v15, %v794_v45  ;;  %v876_v35 = vrot.slane %v875_v16, 4  ;;  %vm4632_vm0 = vmor %vm1235_vm14, %vm1236_vm15  ;;  %v1240_v29 = vrot.slane %v4480_v63, 5 }
  0xac   : > { %v1519_v30 = vrot.slane %v4066_v62, 2  ;;  %v1271_v32 = vrot.slane %v4496_v12, 5  ;;  %v3507_v33 = vcombine.low %v785_v10, %v795_v17  ;;  %v3538_v36 = vrot.slane %v1212_v20, 9  ;;  %v4685_v17 = vld [vmem:[%s5556_s1 + $0xc] sm:$0x3] }
  0xad   : > { %v886_v11 = vrot.slane %v885_v21, 4  ;;  %v881_v38 = vsel %vm4513_vm13, %v876_v35, %v880_v7  ;;  %v1241_v39 = vsel %vm4632_vm0, %v3537_v26, %v1240_v29  ;;  %v1242_v41 = vrot.slane %v1240_v29, 4  ;;  %v1217_v26 = vld [vmem:[#allocation2 + $0x48] sm:$0xe] }
  0xae   : > { %3985 = vmatprep.subr.msk.bf16.mxu1 %vm946_vm9, %v1519_v30  ;;  %v1249_v43 = vrot.slane %v1247_v56, 4  ;;  %3824 = vmatmul.mubr.msk.bf16.gmra.mxu0 %vm921_vm12, %v3507_v33  ;;  %v3521_v45 = vcombine.low %v4478_v60, %v4480_v63  ;;  %v1248_v53 = vsel %vm4632_vm0, %v3538_v36, %v1247_v56  ;;  %v3539_v59 = vrot.slane %v1213_v44, 9  ;;  %v4722_v44 = vld [vmem:[#allocation2 + $0x14] sm:$0x1] }
  0xaf   : > { %v891_v12 = vsel %vm4513_vm13, %v886_v11, %v890_v18  ;;  %v1244_v51 = vsel %vm4632_vm0, %v1242_v41, %v1243_v48  ;;  %v1254_v60 = vrot.slane %v4554_v13, 5  ;;  %v3522_v63 = vcombine.low %v4507_v22, %v4509_v23  ;;  %v4710_v41 = vld [vmem:[%s5556_s1 + $0x8] ss:$0 sps:$4 sm:$0xcc]  }
  0xb0   : > { %v3511_v50 = vcombine.low %v881_v38, %v891_v12  ;;  %v1251_v54 = vsel %vm4632_vm0, %v1249_v43, %v1250_v0  ;;  %v3545_v58 = vcombine.low %v1241_v39, %v1244_v51  ;;  %v1257_v61 = vrot.slane %v4558_v19, 5  ;;  %v4699_v38 = vld [vmem:[#allocation2 + $0x54] sm:$0xe]  ;;  %v1663_v51 = vld [vmem:[#allocation2 + $0x18] sm:$0xf] }
  0xb1   : > { %v3540_v48 = vrot.slane %v1214_v46, 9  ;;  %v1261_v5 = vrot.slane %v4593_v2, 5  ;;  %v3546_v56 = vcombine.low %v1248_v53, %v1251_v54  ;;  %v1255_v1 = vsel %vm4632_vm0, %v3539_v59, %v1254_v60  ;;  %v4727_v53 = vld [vmem:[#allocation2 + $0x1c] sm:$0xf]  ;;  %v4734_v59 = vld [vmem:[#allocation2 + $0x20] sm:$0x1] }
  0xb2   : > { %3832 = vmatmul.mubr.msk.bf16.gmra.mxu1 %vm921_vm12, %v3511_v50  ;;  %3855 = vmatprep.mubr.msk.bf16.mxu0 %vm921_vm12, %v3545_v58  ;;  %v1256_v62 = vrot.slane %v1254_v60, 4  ;;  %v1264_v0 = vrot.slane %v4597_v14, 5  ;;  %v1545_v7 = vsel %vm946_vm9, %v1519_v30, 0  ;;  %v3541_v23 = vrot.slane %v1215_v55, 9 }
  0xb3   : > { %3837 = vmatprep.mubr.msk.bf16.mxu1 %vm921_vm12, %v3521_v45  ;;  %v1263_v22 = vrot.slane %v1261_v5, 4  ;;  %v1268_v19 = vrot.slane %v4494_v8, 5  ;;  %v1926_v9 = vsel %vm946_vm9, %v4582_v49, 0  ;;  %v1262_v15 = vsel %vm4632_vm0, %v3540_v48, %v1261_v5 }
  0xb4   : > { %v1258_v10 = vsel %vm4632_vm0, %v1256_v62, %v1257_v61  ;;  %v1275_v16 = vrot.slane %v4535_v52, 5  ;;  %v3542_v21 = vrot.slane %v1216_v3, 9  ;;  %v3523_v49 = vcombine.low %v4549_v6, %v4554_v13  ;;  %v1660_v6 = vld [vmem:[#allocation2 + $0xc] sm:$0xf]  ;;  %v4701_v13 = vld [vmem:[#allocation2 + $0x10] sm:$0xf] }
  0xb5   : > { %v3547_v18 = vcombine.low %v1255_v1, %v1258_v10  ;;  %v1265_v14 = vsel %vm4632_vm0, %v1263_v22, %v1264_v0  ;;  %v1270_v20 = vrot.slane %v1268_v19, 4  ;;  %v1278_v29 = vrot.slane %v4543_v57, 5  ;;  %v1666_v10 = vld [vmem:[#allocation2 + $0x24] sm:$0xf] }
  0xb6   : > { %3856 = vmatmul.mubr.msk.bf16.vlgmr.msra.gmra.mxu0 %vm921_vm12, %v3546_v56  ;;  %v1277_v35 = vrot.slane %v1275_v16, 4  ;;  %v3524_v30 = vcombine.low %v4576_v42, %v4593_v2  ;;  %v1269_v33 = vsel %vm4632_vm0, %v3541_v23, %v1268_v19  ;;  %v1282_v36 = vrot.slane %v4567_v31, 5 }
  0xb7   : > { %3890 = vmatpush3.bf16.msra.mxu0 %v1926_v9  ;;  %3859 = vmatprep.mubr.msk.bf16.mxu0 %vm921_vm12, %v3547_v18  ;;  %v1272_v11 = vsel %vm4632_vm0, %v1270_v20, %v1271_v32  ;;  %v3548_v57 = vcombine.low %v1262_v15, %v1265_v14  ;;  %v3525_v39 = vcombine.low %v4489_v4, %v4494_v8  ;;  %v3543_v2 = vrot.slane %v1217_v26, 9 }
  0xb8   : > { %v3526_v42 = vcombine.low %v4530_v47, %v4535_v52  ;;  %3988 = vmatprep.subr.msk.bf16.mxu0 %vm946_vm9, %v4685_v17  ;;  %v4717_v32 = vsel %vm4632_vm0, %v3542_v21, %v1275_v16  ;;  %v3527_v4 = vcombine.low %v4564_v27, %v4567_v31  ;;  %v1284_v8 = vrot.slane %v1282_v36, 4 }
  0xb9   : > { %v1285_v43 = vrot.slane %v4572_v37, 5  ;;  %v3549_v12 = vcombine.low %v1269_v33, %v1272_v11  ;;  %v1279_v45 = vsel %vm4632_vm0, %v1277_v35, %v1278_v29  ;;  %v1685_v46 = vshrl.u32 %v1660_v6, 16  ;;  %v4759_v35 = vld [vmem:[#allocation2 + $0x28] sm:$0xf] }
  0xba   : > { %3838 = vmatmul.mubr.msk.bf16.vlgmr.msra.gmra.mxu1 %vm921_vm12, %v3522_v63  ;;  %v1688_v50 = vshll.u32 %v1660_v6, 16  ;;  %v3528_v54 = vcombine.low %v4602_v25, %v4609_v34  ;;  %v1289_v55 = vrot.slane %v4609_v34, 5  ;;  %v1694_v37 = vshll.u32 %v4701_v13, 16  ;;  %v4838_v34 = vld [vmem:[#allocation2 + $0x5c] sm:$0x1] }
  0xbb   : > { %3872 = vmatpush3.bf16.msra.mxu1 %v1545_v7  ;;  %3841 = vmatprep.mubr.msk.bf16.mxu1 %vm921_vm12, %v3523_v49  ;;  %v1698_v58 = vshrl.u32 %v4701_v13, 16  ;;  %v1283_v60 = vsel %vm4632_vm0, %v3543_v2, %v1282_v36  ;;  %v3544_v63 = vrot.slane %v4699_v38, 9  ;;  %v1292_v61 = vrot.slane %v4613_v40, 5  ;;  %v4762_v38 = vld [vmem:[#allocation2 + $0x2c] sm:$0x1] }
  0xbc   : > { %v1687_v48 = vrot.slane %v1685_v46, 4  ;;  %v1286_v5 = vsel %vm4632_vm0, %v1284_v8, %v1285_v43  ;;  %v1690_v56 = vrot.slane %v1688_v50, 5  ;;  %v4742_v1 = vrot.slane %v1694_v37, 5  ;;  %v1672_v37 = vld [vmem:[#allocation2 + $0x3c] sm:$0xf] }
  0xbd   : > { %v1700_v62 = vrot.slane %v1698_v58, 4  ;;  %v1704_v0 = vshll.u32 %v4722_v44, 16  ;;  %v2157_v3 = vrot.slane %v4710_v41, 2  ;;  %v1709_v7 = vshrl.u32 %v1663_v51, 16 }
  0xbe   : > { %3860 = vmatmul.mubr.msk.bf16.gmra.mxu0 %vm921_vm12, %v3548_v57  ;;  %v1712_v22 = vshll.u32 %v1663_v51, 16  ;;  %v1291_v23 = vrot.slane %v1289_v55, 4  ;;  %v1691_v40 = vor.u32 %v1690_v56, %v1687_v48  ;;  %v1718_v9 = vshll.u32 %v4727_v53, 16 }
  0xbf   : > { %3863 = vmatprep.mubr.msk.bf16.mxu0 %vm921_vm12, %v3549_v12  ;;  %v1701_v19 = vor.u32 %v1700_v62, %v4742_v1  ;;  %3987 = vmatprep.subr.msk.bf16.mxu1 %vm946_vm9, %v2157_v3  ;;  %v1711_v15 = vrot.slane %v1709_v7, 4  ;;  %v1722_v18 = vshrl.u32 %v4727_v53, 16  ;;  %v1728_v14 = vshll.u32 %v4734_v59, 16 }
  0xc0   : > { %v1714_v16 = vrot.slane %v1712_v22, 5  ;;  %v3550_v20 = vcombine.low %v4717_v32, %v1279_v45  ;;  %v3551_v21 = vcombine.low %v1283_v60, %v1286_v5  ;;  %v1692_v26 = vrot.slane %v1691_v40, 4  ;;  %v1669_v32 = vld [vmem:[#allocation2 + $0x30] sm:$0xf]  ;;  %v4773_v45 = vld [vmem:[#allocation2 + $0x34] sm:$0xf] }
  0xc1   : > { %v4757_v49 = vrot.slane %v1718_v9, 5  ;;  %v1702_v29 = vrot.slane %v1701_v19, 4  ;;  %v1706_v33 = vrot.slane %v1704_v0, 5  ;;  %v1724_v36 = vrot.slane %v1722_v18, 4  ;;  %v4783_v0 = vld [vmem:[#allocation2 + $0x40] sm:$0xf] }
  0xc2   : > { %3842 = vmatmul.mubr.msk.bf16.gmra.mxu1 %vm921_vm12, %v3524_v30  ;;  %v1715_v11 = vor.u32 %v1714_v16, %v1711_v15  ;;  %v1290_v6 = vsel %vm4632_vm0, %v3544_v63, %v1289_v55  ;;  %v1293_v30 = vsel %vm4632_vm0, %v1291_v23, %v1292_v61  ;;  %v1733_v57 = vshrl.u32 %v1666_v10, 16  ;;  %v4791_v16 = vld [vmem:[#allocation2 + $0x44] sm:$0x1] }
  0xc3   : > { %3845 = vmatprep.mubr.msk.bf16.mxu1 %vm921_vm12, %v3525_v39  ;;  %v1736_v2 = vshll.u32 %v1666_v10, 16  ;;  %v1697_v8 = vsel %vm4513_vm13, %v1692_v26, %v4742_v1  ;;  %v1725_v39 = vor.u32 %v1724_v36, %v4757_v49  ;;  %v1730_v43 = vrot.slane %v1728_v14, 5  ;;  %v4781_v1 = vld [vmem:[#allocation2 + $0x38] sm:$0x1]  ;;  %v1675_v26 = vld [vmem:[#allocation2 + $0x48] sm:$0xf] }
  0xc4   : > { %v1742_v12 = vshll.u32 %v4759_v35, 16  ;;  %v1735_v46 = vrot.slane %v1733_v57, 4  ;;  %v1746_v51 = vshrl.u32 %v4759_v35, 16  ;;  %v1752_v55 = vshll.u32 %v4762_v38, 16  ;;  %v4074_v57 = vld [vmem:[#allocation2 + $0xc] sm:$0xff]  }
  0xc5   : > { %v1738_v50 = vrot.slane %v1736_v2, 5  ;;  %v1707_v58 = vsel %vm4513_vm13, %v1702_v29, %v1706_v33  ;;  %v1716_v60 = vrot.slane %v1715_v11, 4  ;;  %v1757_v61 = vshrl.u32 %v1669_v32, 16  ;;  %v4804_v33 = vld [vmem:[#allocation2 + $0x4c] sm:$0xf] }
  0xc6   : > { %3864 = vmatmul.mubr.msk.bf16.gmra.mxu0 %vm921_vm12, %v3550_v20  ;;  %v1744_v63 = vrot.slane %v1742_v12, 5  ;;  %v1726_v48 = vrot.slane %v1725_v39, 4  ;;  %v1748_v56 = vrot.slane %v1746_v51, 4  ;;  %v1760_v62 = vshll.u32 %v1669_v32, 16 }
  0xc7   : > { %3867 = vmatprep.mubr.msk.bf16.mxu0 %vm921_vm12, %v3551_v21  ;;  %v1739_v5 = vor.u32 %v1738_v50, %v1735_v46  ;;  %v3552_v7 = vcombine.low %v1290_v6, %v1293_v30  ;;  %v1759_v22 = vrot.slane %v1757_v61, 4  ;;  %v1766_v23 = vshll.u32 %v4773_v45, 16 }
  0xc8   : > { %v1770_v40 = vshrl.u32 %v4773_v45, 16  ;;  %v3578_v19 = vcombine.low %v1697_v8, %v1707_v58  ;;  %v1749_v9 = vor.u32 %v1748_v56, %v1744_v63  ;;  %v1754_v10 = vrot.slane %v1752_v55, 5  ;;  %v4833_v56 = vld [vmem:[#allocation2 + $0x50] sm:$0x1] }
  0xc9   : > { %v1762_v15 = vrot.slane %v1760_v62, 5  ;;  %v1740_v18 = vrot.slane %v1739_v5, 4  ;;  %v4797_v14 = vrot.slane %v1766_v23, 5  ;;  %v1781_v21 = vshrl.u32 %v1672_v37, 16 }
  0xca   : > { %3846 = vmatmul.mubr.msk.bf16.gmra.mxu1 %vm921_vm12, %v3526_v42  ;;  %v1772_v20 = vrot.slane %v1770_v40, 4  ;;  %v1721_v47 = vsel %vm4513_vm13, %v1716_v60, %v4757_v49  ;;  %v1731_v52 = vsel %vm4513_vm13, %v1726_v48, %v1730_v43  ;;  %v1750_v42 = vrot.slane %v1749_v9, 4  ;;  %v4830_v48 = vld [vmem:[#allocation2 + $0x58] sm:$0xf] }
  0xcb   : > { %3849 = vmatprep.mubr.msk.bf16.mxu1 %vm921_vm12, %v3527_v4  ;;  %v1784_v29 = vshll.u32 %v1672_v37, 16  ;;  %v1763_v27 = vor.u32 %v1762_v15, %v1759_v22  ;;  %v1776_v31 = vshll.u32 %v4781_v1, 16  ;;  %v1783_v4 = vrot.slane %v1781_v21, 4  ;;  %v1678_v37 = vld [vmem:[#allocation2 + $0x54] sm:$0xf]  ;;  %v4076_v21 = vld [vmem:[#allocation2 + $0x18] sm:$0xff]  }
  0xcc   : > { %v1790_v11 = vshll.u32 %v4783_v0, 16  ;;  %v4811_v36 = vsel %vm946_vm9, %v2157_v3, 0  ;;  %v1773_v49 = vor.u32 %v1772_v20, %v4797_v14  ;;  %v1794_v30 = vshrl.u32 %v4783_v0, 16  ;;  %v4846_v20 = vld [vmem:[#allocation2 + $0x64] sm:$0xf] }
  0xcd   : > { %v1786_v6 = vrot.slane %v1784_v29, 5  ;;  %v1745_v2 = vsel %vm4513_vm13, %v1740_v18, %v1744_v63  ;;  %v1755_v32 = vsel %vm4513_vm13, %v1750_v42, %v1754_v10  ;;  %v1800_v41 = vshll.u32 %v4791_v16, 16 }
  0xce   : > { %3868 = vmatmul.mubr.msk.bf16.gmra.mxu0 %vm921_vm12, %v3552_v7  ;;  %v4820_v8 = vrot.slane %v1790_v11, 5  ;;  %v3579_v3 = vcombine.low %v1721_v47, %v1731_v52  ;;  %v1796_v43 = vrot.slane %v1794_v30, 4  ;;  %v1805_v12 = vshrl.u32 %v1675_v26, 16 }
  0xcf   : > { %3891 = vmatprep.mubr.msk.bf16.mxu0 %vm921_vm12, %v3578_v19  ;;  %v1787_v39 = vor.u32 %v1786_v6, %v1783_v4  ;;  %v1764_v46 = vrot.slane %v1763_v27, 4  ;;  %v1778_v50 = vrot.slane %v1776_v31, 5  ;;  %v1808_v51 = vshll.u32 %v1675_v26, 16  ;;  %v1681_v19 = vld [vmem:[#allocation2 + $0x60] sm:$0xf] }
  0xd0   : > { %v1814_v55 = vshll.u32 %v4804_v33, 16  ;;  %v3580_v58 = vcombine.low %v1745_v2, %v1755_v32  ;;  %v1774_v60 = vrot.slane %v1773_v49, 4  ;;  %v1797_v63 = vor.u32 %v1796_v43, %v4820_v8 }
  0xd1   : > { %v1802_v61 = vrot.slane %v1800_v41, 5  ;;  %v1788_v5 = vrot.slane %v1787_v39, 4  ;;  %v1807_v62 = vrot.slane %v1805_v12, 4  ;;  %v1810_v7 = vrot.slane %v1808_v51, 5 }
  0xd2   : > { %3850 = vmatmul.mubr.msk.bf16.gmra.mxu1 %vm921_vm12, %v3528_v54  ;;  %v1818_v22 = vshrl.u32 %v4804_v33, 16  ;;  %v1798_v23 = vrot.slane %v1797_v63, 4  ;;  %v4836_v25 = vrot.slane %v1814_v55, 5  ;;  %v1829_v54 = vshrl.u32 %v1678_v37, 16  ;;  %v4878_v55 = vld [vmem:[#allocation2 + $0x68] sm:$0x1] }
  0xd3   : > { %3873 = vmatprep.mubr.msk.bf16.mxu1 %vm921_vm12, %v4074_v57  ;;  %v1832_v40 = vshll.u32 %v1678_v37, 16  ;;  %v2381_v9 = vsel %vm946_vm9, %v4685_v17, 0  ;;  %v1769_v10 = vsel %vm4513_vm13, %v1764_v46, %v4797_v14  ;;  %v1838_v18 = vshll.u32 %v4830_v48, 16  ;;  %v4854_v17 = vld [vmem:[%s5556_s1 + $0x10] sm:$0x3]  ;;  %v4077_v14 = vld [vmem:[#allocation2 + $0x24] sm:$0xff]  }
  0xd4   : > { %v1820_v15 = vrot.slane %v1818_v22, 4  ;;  %v1779_v26 = vsel %vm4513_vm13, %v1774_v60, %v1778_v50  ;;  %v1831_v47 = vrot.slane %v1829_v54, 4  ;;  %v1842_v42 = vshrl.u32 %v4830_v48, 16  ;;  %v4873_v39 = vld [vmem:[%s5556_s1 + $0xc] ss:$0 sps:$4 sm:$0xcc]  }
  0xd5   : > { %v1834_v52 = vrot.slane %v1832_v40, 5  ;;  %v1793_v29 = vsel %vm4513_vm13, %v1788_v5, %v4820_v8  ;;  %v1811_v27 = vor.u32 %v1810_v7, %v1807_v62  ;;  %v1824_v31 = vshll.u32 %v4833_v56, 16  ;;  %v4078_v7 = vld [vmem:[#allocation2 + $0x30] sm:$0xff]   ;;  %v4079_v22 = vld [vmem:[#allocation2 + $0x3c] sm:$0xff]  }
  0xd6   : > { %3892 = vmatmul.mubr.msk.bf16.vlgmr.msra.gmra.mxu0 %vm921_vm12, %v3579_v3  ;;  %v1840_v4 = vrot.slane %v1838_v18, 5  ;;  %v1803_v11 = vsel %vm4513_vm13, %v1798_v23, %v1802_v61  ;;  %v1821_v49 = vor.u32 %v1820_v15, %v4836_v25  ;;  %v1844_v6 = vrot.slane %v1842_v42, 4  ;;  %v2041_v18 = vld [vmem:[#allocation2 + $0xc] sm:$0xe] }
  0xd7   : > { %3926 = vmatpush3.bf16.msra.mxu0 %v2381_v9  ;;  %3895 = vmatprep.mubr.msk.bf16.mxu0 %vm921_vm12, %v3580_v58  ;;  %v1853_v30 = vshrl.u32 %v1681_v19, 16  ;;  %v1835_v57 = vor.u32 %v1834_v52, %v1831_v47  ;;  %v1848_v2 = vshll.u32 %v4838_v34, 16  ;;  %v1856_v32 = vshll.u32 %v1681_v19, 16 }
  0xd8   : > { %v1862_v8 = vshll.u32 %v4846_v20, 16  ;;  %3990 = vmatprep.subr.msk.bf16.mxu0 %vm946_vm9, %v4854_v17  ;;  %v3581_v41 = vcombine.low %v1769_v10, %v1779_v26  ;;  %v1845_v3 = vor.u32 %v1844_v6, %v1840_v4  ;;  %v3582_v43 = vcombine.low %v1793_v29, %v1803_v11  ;;  %v4080_v11 = vld [vmem:[#allocation2 + $0x48] sm:$0xff]   ;;  %v4081_v6 = vld [vmem:[#allocation2 + $0x54] sm:$0xff]  }
  0xd9   : > { %v1812_v12 = vrot.slane %v1811_v27, 4  ;;  %v1826_v46 = vrot.slane %v1824_v31, 5  ;;  %v1866_v50 = vshrl.u32 %v4846_v20, 16  ;;  %v1822_v51 = vrot.slane %v1821_v49, 4  ;;  %v2043_v49 = vld [vmem:[#allocation2 + $0x24] sm:$0xe] }
  0xda   : > { %3874 = vmatmul.mubr.msk.bf16.vlgmr.msra.gmra.mxu1 %vm921_vm12, %v4076_v21  ;;  %v1855_v37 = vrot.slane %v1853_v30, 4  ;;  %v1858_v58 = vrot.slane %v1856_v32, 5  ;;  %v1864_v60 = vrot.slane %v1862_v8, 5  ;;  %v1836_v63 = vrot.slane %v1835_v57, 4 }
  0xdb   : > { %3908 = vmatpush3.bf16.msra.mxu1 %v4811_v36  ;;  %3877 = vmatprep.mubr.msk.bf16.mxu1 %vm921_vm12, %v4077_v14  ;;  %v1846_v61 = vrot.slane %v1845_v3, 4  ;;  %v1850_v5 = vrot.slane %v1848_v2, 5  ;;  %v1868_v62 = vrot.slane %v1866_v50, 4  ;;  %v2740_v36 = vrot.slane %v4873_v39, 2  ;;  %v2042_v14 = vld [vmem:[#allocation2 + $0x18] sm:$0xe] }
  0xdc   : > { %v1817_v23 = vsel %vm4513_vm13, %v1812_v12, %v4836_v25  ;;  %v1872_v54 = vshll.u32 %v4878_v55, 16  ;;  %v1827_v40 = vsel %vm4513_vm13, %v1822_v51, %v1826_v46  ;;  %v1859_v19 = vor.u32 %v1858_v58, %v1855_v37  ;;  %v2045_v46 = vld [vmem:[#allocation2 + $0x3c] sm:$0xe] }
  0xdd   : > { %v1869_v9 = vor.u32 %v1868_v62, %v1864_v60  ;;  %3989 = vmatprep.subr.msk.bf16.mxu1 %vm946_vm9, %v2740_v36  ;;  %v1841_v10 = vsel %vm4513_vm13, %v1836_v63, %v1840_v4  ;;  %v1851_v15 = vsel %vm4513_vm13, %v1846_v61, %v1850_v5  ;;  %v2075_v25 = vrot.slane %v4701_v13, 5  ;;  %v4083_v37 = vld [vmem:[#allocation2 + $0x18] sm:$0xff]  }
  0xde   : > { %3896 = vmatmul.mubr.msk.bf16.gmra.mxu0 %vm921_vm12, %v3581_v41  ;;  %v3583_v21 = vcombine.low %v1817_v23, %v1827_v40  ;;  %v1874_v26 = vrot.slane %v1872_v54, 5  ;;  %v3584_v47 = vcombine.low %v1841_v10, %v1851_v15  ;;  %v1860_v52 = vrot.slane %v1859_v19, 4  ;;  %v2044_v41 = vld [vmem:[#allocation2 + $0x30] sm:$0xe]  ;;  %v2496_v63 = vld [vmem:[#allocation2 + $0x18] sm:$0xf] }
  0xdf   : > { %3899 = vmatprep.mubr.msk.bf16.mxu0 %vm921_vm12, %v3582_v43  ;;  %v1870_v42 = vrot.slane %v1869_v9, 4  ;;  %v2082_v29 = vrot.slane %v4727_v53, 5  ;;  %v3594_v27 = vrot.slane %v2041_v18, 9  ;;  %v2077_v31 = vrot.slane %v2075_v25, 4  ;;  %v4926_v61 = vld [vmem:[#allocation2 + $0x1c] sm:$0xf] }
  0xe0   : > { %v2078_v4 = vrot.slane %v4722_v44, 5  ;;  %v2089_v13 = vrot.slane %v4759_v35, 5  ;;  %v3595_v30 = vrot.slane %v2042_v14, 9  ;;  %v1865_v57 = vsel %vm4513_vm13, %v1860_v52, %v1864_v60  ;;  %v2046_v40 = vld [vmem:[#allocation2 + $0x48] sm:$0xe] }
  0xe1   : > { %v1875_v53 = vsel %vm4513_vm13, %v1870_v42, %v1874_v26  ;;  %v2084_v2 = vrot.slane %v2082_v29, 4  ;;  %v2085_v32 = vrot.slane %v4734_v59, 5  ;;  %v2076_v44 = vsel %vm4632_vm0, %v3594_v27, %v2075_v25  ;;  %v2047_v52 = vld [vmem:[#allocation2 + $0x54] sm:$0xe]  ;;  %v2048_v42 = vld [vmem:[#allocation2 + $0x60] sm:$0xe] }
  0xe2   : > { %3878 = vmatmul.mubr.msk.bf16.gmra.mxu1 %vm921_vm12, %v4078_v7  ;;  %v2079_v35 = vsel %vm4632_vm0, %v2077_v31, %v2078_v4  ;;  %v3596_v8 = vrot.slane %v2043_v49, 9  ;;  %v2096_v3 = vrot.slane %v4773_v45, 5  ;;  %v2091_v43 = vrot.slane %v2089_v13, 4  ;;  %v4082_v7 = vld [vmem:[#allocation2 + $0x60] sm:$0xff]  }
  0xe3   : > { %3881 = vmatprep.mubr.msk.bf16.mxu1 %vm921_vm12, %v4079_v22  ;;  %v2092_v12 = vrot.slane %v4762_v38, 5  ;;  %v2103_v50 = vrot.slane %v4783_v0, 5  ;;  %v3585_v59 = vcombine.low %v1865_v57, %v1875_v53  ;;  %v3602_v51 = vcombine.low %v2076_v44, %v2079_v35 }
  0xe4   : > { %v4920_v58 = vsel %vm4632_vm0, %v3595_v30, %v2082_v29  ;;  %v4924_v45 = vsel %vm4632_vm0, %v2084_v2, %v2085_v32  ;;  %v3597_v60 = vrot.slane %v2044_v41, 9  ;;  %v4930_v38 = vsel %vm4632_vm0, %v3596_v8, %v2089_v13  ;;  %v4086_v29 = vld [vmem:[#allocation2 + $0x30] sm:$0xff]   ;;  %v2499_v32 = vld [vmem:[#allocation2 + $0x24] sm:$0xf] }
  0xe5   : > { %v2098_v0 = vrot.slane %v2096_v3, 4  ;;  %v2099_v5 = vrot.slane %v4781_v1, 5  ;;  %v3598_v62 = vrot.slane %v2045_v46, 9  ;;  %v4935_v22 = vsel %vm4632_vm0, %v2091_v43, %v2092_v12  ;;  %v2881_v12 = vld [vmem:[#allocation2 + $0x18] sm:$0xe] }
  0xe6   : > { %3900 = vmatmul.mubr.msk.bf16.gmra.mxu0 %vm921_vm12, %v3583_v21  ;;  %v2105_v23 = vrot.slane %v2103_v50, 4  ;;  %v2106_v54 = vrot.slane %v4791_v16, 5  ;;  %v2110_v19 = vrot.slane %v4804_v33, 5  ;;  %v2521_v9 = vshrl.u32 %v2496_v63, 16 }
  0xe7   : > { %3903 = vmatprep.mubr.msk.bf16.mxu0 %vm921_vm12, %v3584_v47  ;;  %v2524_v10 = vshll.u32 %v2496_v63, 16  ;;  %v2530_v15 = vshll.u32 %v4926_v61, 16  ;;  %v2534_v1 = vshrl.u32 %v4926_v61, 16  ;;  %v3603_v25 = vcombine.low %v4920_v58, %v4924_v45 }
  0xe8   : > { %v3019_v18 = vsel %vm946_vm9, %v4854_v17, 0  ;;  %v4949_v16 = vsel %vm4632_vm0, %v3597_v60, %v2096_v3  ;;  %v2117_v33 = vrot.slane %v4830_v48, 5  ;;  %v3604_v21 = vcombine.low %v4930_v38, %v4935_v22  ;;  %v4085_v17 = vld [vmem:[#allocation2 + $0x24] sm:$0xff]   ;;  %v2502_v38 = vld [vmem:[#allocation2 + $0x30] sm:$0xf] }
  0xe9   : > { %v4956_v26 = vsel %vm4632_vm0, %v2098_v0, %v2099_v5  ;;  %v3599_v47 = vrot.slane %v2046_v40, 9  ;;  %v2124_v14 = vrot.slane %v4846_v20, 5  ;;  %v4962_v27 = vsel %vm4632_vm0, %v3598_v62, %v2103_v50  ;;  %v4989_v50 = vld [vmem:[#allocation2 + $0x28] sm:$0xf]  ;;  %v4087_v0 = vld [vmem:[#allocation2 + $0x3c] sm:$0xff]  }
  0xea   : > { %3882 = vmatmul.mubr.msk.bf16.gmra.mxu1 %vm921_vm12, %v4080_v11  ;;  %v4966_v48 = vsel %vm4632_vm0, %v2105_v23, %v2106_v54  ;;  %v2112_v31 = vrot.slane %v2110_v19, 4  ;;  %v2113_v4 = vrot.slane %v4833_v56, 5  ;;  %v2498_v11 = vld [vmem:[#allocation2 + $0x20] sm:$0x1]  ;;  %v2523_v49 = vrot.slane %v2521_v9, 4 }
  0xeb   : > { %3885 = vmatprep.mubr.msk.bf16.mxu1 %vm921_vm12, %v4081_v6  ;;  %v2526_v20 = vrot.slane %v2524_v10, 5  ;;  %v4970_v13 = vrot.slane %v2530_v15, 5  ;;  %v2536_v6 = vrot.slane %v2534_v1, 4  ;;  %v3600_v30 = vrot.slane %v2047_v52, 9  ;;  %v5016_v23 = vld [vmem:[#allocation2 + $0x34] sm:$0xf] }
  0xec   : > { %v2119_v57 = vrot.slane %v2117_v33, 4  ;;  %v2120_v53 = vrot.slane %v4838_v34, 5  ;;  %v3601_v2 = vrot.slane %v2048_v42, 9  ;;  %v3605_v44 = vcombine.low %v4949_v16, %v4956_v26  ;;  %v2505_v10 = vld [vmem:[#allocation2 + $0x3c] sm:$0xf]  ;;  %v4088_v15 = vld [vmem:[#allocation2 + $0x48] sm:$0xff]  }
  0xed   : > { %v2126_v35 = vrot.slane %v2124_v14, 4  ;;  %v2127_v56 = vrot.slane %v4878_v55, 5  ;;  %v2915_v8 = vrot.slane %v4926_v61, 5  ;;  %v3606_v41 = vcombine.low %v4962_v27, %v4966_v48 }
  0xee   : > { %3904 = vmatmul.mubr.msk.bf16.gmra.mxu0 %vm921_vm12, %v3585_v59  ;;  %v4981_v3 = vsel %vm4632_vm0, %v3599_v47, %v2110_v19  ;;  %v4985_v34 = vsel %vm4632_vm0, %v2112_v31, %v2113_v4  ;;  %v2540_v43 = vshll.u32 %v2498_v11, 16  ;;  %v2527_v46 = vor.u32 %v2526_v20, %v2523_v49  ;;  %v5037_v31 = vld [vmem:[#allocation2 + $0x40] sm:$0xf] }
  0xef   : > { %3927 = vmatprep.mubr.msk.bf16.mxu0 %vm921_vm12, %v4083_v37  ;;  %v2537_v55 = vor.u32 %v2536_v6, %v4970_v13  ;;  %v2545_v59 = vshrl.u32 %v2499_v32, 16  ;;  %v2766_v37 = vsel %vm946_vm9, %v2740_v36, 0  ;;  %v4997_v58 = vsel %vm4632_vm0, %v3600_v30, %v2117_v33 }
  0xf0   : > { %v5001_v45 = vsel %vm4632_vm0, %v2119_v57, %v2120_v53  ;;  %v5005_v60 = vsel %vm4632_vm0, %v3601_v2, %v2124_v14  ;;  %v5009_v39 = vsel %vm4632_vm0, %v2126_v35, %v2127_v56  ;;  %v3652_v36 = vrot.slane %v2881_v12, 9  ;;  %v2882_v53 = vld [vmem:[#allocation2 + $0x24] sm:$0xe]  ;;  %v2504_v56 = vld [vmem:[#allocation2 + $0x38] sm:$0x1] }
  0xf1   : > { %v2917_v63 = vrot.slane %v2915_v8, 4  ;;  %v2918_v61 = vrot.slane %v2498_v11, 5  ;;  %v3607_v5 = vcombine.low %v4981_v3, %v4985_v34  ;;  %v2542_v62 = vrot.slane %v2540_v43, 5 }
  0xf2   : > { %3886 = vmatmul.mubr.msk.bf16.gmra.mxu1 %vm921_vm12, %v4082_v7  ;;  %v2554_v7 = vshll.u32 %v4989_v50, 16  ;;  %v2558_v22 = vshrl.u32 %v4989_v50, 16  ;;  %v2528_v54 = vrot.slane %v2527_v46, 4  ;;  %v2538_v40 = vrot.slane %v2537_v55, 4  ;;  %v2883_v55 = vld [vmem:[#allocation2 + $0x30] sm:$0xe] }
  0xf3   : > { %3909 = vmatprep.mubr.msk.bf16.mxu1 %vm921_vm12, %v3602_v51  ;;  %v2548_v51 = vshll.u32 %v2499_v32, 16  ;;  %v2547_v19 = vrot.slane %v2545_v59, 4  ;;  %v3608_v1 = vcombine.low %v4997_v58, %v5001_v45  ;;  %v2569_v33 = vshrl.u32 %v2502_v38, 16 }
  0xf4   : > { %v2572_v47 = vshll.u32 %v2502_v38, 16  ;;  %v5027_v52 = vsel %vm4632_vm0, %v3652_v36, %v2915_v8  ;;  %v2578_v42 = vshll.u32 %v5016_v23, 16  ;;  %v2582_v14 = vshrl.u32 %v5016_v23, 16 }
  0xf5   : > { %v2550_v9 = vrot.slane %v2548_v51, 5  ;;  %v2593_v4 = vshrl.u32 %v2505_v10, 16  ;;  %v2596_v11 = vshll.u32 %v2505_v10, 16  ;;  %v2533_v49 = vsel %vm4513_vm13, %v2528_v54, %v4970_v13 }
  0xf6   : > { %3928 = vmatmul.mubr.msk.bf16.vlgmr.msra.gmra.mxu0 %vm921_vm12, %v4085_v17  ;;  %v5035_v17 = vrot.slane %v2554_v7, 5  ;;  %v2543_v20 = vsel %vm4513_vm13, %v2538_v40, %v2542_v62  ;;  %v2922_v2 = vrot.slane %v4989_v50, 5  ;;  %v2571_v32 = vrot.slane %v2569_v33, 4 }
  0xf7   : > { %3962 = vmatpush3.bf16.msra.mxu0 %v3019_v18  ;;  %3931 = vmatprep.mubr.msk.bf16.mxu0 %vm921_vm12, %v4086_v29  ;;  %v5023_v18 = vld [vmem:[#allocation2 + $0x2c] sm:$0x1]  ;;  %v2560_v29 = vrot.slane %v2558_v22, 4  ;;  %v2551_v6 = vor.u32 %v2550_v9, %v2547_v19  ;;  %v2574_v35 = vrot.slane %v2572_v47, 5  ;;  %v5050_v8 = vrot.slane %v2578_v42, 5 }
  0xf8   : > { %v2564_v30 = vshll.u32 %v5023_v18, 16  ;;  %v2584_v13 = vrot.slane %v2582_v14, 4  ;;  %v2602_v43 = vshll.u32 %v5037_v31, 16  ;;  %v2606_v12 = vshrl.u32 %v5037_v31, 16  ;;  %v5071_v22 = vld [vmem:[#allocation2 + $0x4c] sm:$0xf] }
  0xf9   : > { %v2561_v46 = vor.u32 %v2560_v29, %v5035_v17  ;;  %v2929_v50 = vrot.slane %v5016_v23, 5  ;;  %v2595_v59 = vrot.slane %v2593_v4, 4  ;;  %v2598_v51 = vrot.slane %v2596_v11, 5  ;;  %v5078_v9 = vld [vmem:[#allocation2 + $0x44] sm:$0x1] }
  0xfa   : > { %3910 = vmatmul.mubr.msk.bf16.vlgmr.msra.gmra.mxu1 %vm921_vm12, %v3603_v25  ;;  %v3609_v25 = vcombine.low %v5005_v60, %v5009_v39  ;;  %v5064_v36 = vcombine.low %v2533_v49, %v2543_v20  ;;  %v5068_v16 = vrot.slane %v2564_v30, 5  ;;  %v3653_v26 = vrot.slane %v2882_v53, 9 }
  0xfb   : > { %3944 = vmatpush3.bf16.msra.mxu1 %v2766_v37  ;;  %3913 = vmatprep.mubr.msk.bf16.mxu1 %vm921_vm12, %v3604_v21  ;;  %v5031_v21 = vsel %vm4632_vm0, %v2917_v63, %v2918_v61  ;;  %v4089_v37 = vld [vmem:[#allocation2 + $0x54] sm:$0xff]   ;;  %v5066_v63 = vrot.slane %v2551_v6, 4  ;;  %v4090_v61 = vld [vmem:[#allocation2 + $0x60] sm:$0xff]   ;;  %v2924_v38 = vrot.slane %v2922_v2, 4  ;;  %v2575_v62 = vor.u32 %v2574_v35, %v2571_v32 }
  0xfc   : > { %v3660_v57 = vcombine.low %v5027_v52, %v5031_v21  ;;  %v2588_v7 = vshll.u32 %v2504_v56, 16  ;;  %v2585_v27 = vor.u32 %v2584_v13, %v5050_v8  ;;  %v3654_v48 = vrot.slane %v2883_v55, 9 }
  0xfd   : > { %v2608_v23 = vrot.slane %v2606_v12, 4  ;;  %v5076_v54 = vrot.slane %v2561_v46, 4  ;;  %v2931_v40 = vrot.slane %v2929_v50, 4  ;;  %v2932_v19 = vrot.slane %v2504_v56, 5  ;;  %v4091_v56 = vld [vmem:[#allocation2 + $0x6c] sm:$0xff]  }
  0xfe   : > { %3932 = vmatmul.mubr.msk.bf16.gmra.mxu0 %vm921_vm12, %v4087_v0  ;;  %v2925_v0 = vrot.slane %v5023_v18, 5  ;;  %v2599_v10 = vor.u32 %v2598_v51, %v2595_v59  ;;  %v2626_v47 = vshll.u32 %v5071_v22, 16  ;;  %v2630_v42 = vshrl.u32 %v5071_v22, 16  ;;  %v2511_v12 = vld [vmem:[#allocation2 + $0x54] sm:$0xf] }
  0xff   : > { %3935 = vmatprep.mubr.msk.bf16.mxu0 %vm921_vm12, %v4088_v15  ;;  %v2884_v15 = vld [vmem:[#allocation2 + $0x3c] sm:$0xe]  ;;  %v5086_v14 = vsel %vm4632_vm0, %v3653_v26, %v2922_v2  ;;  %v5092_v4 = vrot.slane %v2575_v62, 4  ;;  %v5094_v11 = vrot.slane %v2588_v7, 5  ;;  %v5096_v49 = vrot.slane %v2585_v27, 4 }
 0x100   : > { %v5090_v29 = vsel %vm4632_vm0, %v2924_v38, %v2925_v0  ;;  %v5100_v20 = vsel %vm4632_vm0, %v3654_v48, %v2929_v50  ;;  %v2612_v30 = vshll.u32 %v5078_v9, 16  ;;  %v5110_v53 = vsel %vm4632_vm0, %v2931_v40, %v2932_v19  ;;  %v5140_v59 = vld [vmem:[#allocation2 + $0x58] sm:$0xf]  ;;  %v2514_v0 = vld [vmem:[#allocation2 + $0x60] sm:$0xf] }
 0x101   : > { %v5112_v2 = vrot.slane %v2599_v10, 4  ;;  %v3655_v32 = vrot.slane %v2884_v15, 9  ;;  %v2936_v35 = vrot.slane %v5037_v31, 5  ;;  %v5119_v3 = vrot.slane %v2626_v47, 5  ;;  %v5155_v62 = vld [vmem:[#allocation2 + $0x64] sm:$0xf] }
 0x102   : > { %3914 = vmatmul.mubr.msk.bf16.gmra.mxu1 %vm921_vm12, %v3605_v44  ;;  %v2508_v44 = vld [vmem:[#allocation2 + $0x48] sm:$0xf]  ;;  %v2632_v34 = vrot.slane %v2630_v42, 4  ;;  %v2567_v31 = vsel %vm4513_vm13, %v5076_v54, %v5068_v16  ;;  %v3661_v58 = vcombine.low %v5086_v14, %v5090_v29  ;;  %v2581_v45 = vsel %vm4513_vm13, %v5092_v4, %v5050_v8  ;;  %v2513_v29 = vld [vmem:[#allocation2 + $0x5c] sm:$0x1] }
 0x103   : > { %3917 = vmatprep.mubr.msk.bf16.mxu1 %vm921_vm12, %v3606_v41  ;;  %v5074_v41 = vrot.slane %v2602_v43, 5  ;;  %v2617_v18 = vshrl.u32 %v2508_v44, 16  ;;  %v2620_v33 = vshll.u32 %v2508_v44, 16  ;;  %v2614_v55 = vrot.slane %v2612_v30, 5  ;;  %v2885_v16 = vld [vmem:[#allocation2 + $0x48] sm:$0xe] }
 0x104   : > { %v2943_v50 = vrot.slane %v5071_v22, 5  ;;  %v3662_v51 = vcombine.low %v5100_v20, %v5110_v53  ;;  %v2938_v8 = vrot.slane %v2936_v35, 4  ;;  %v2641_v7 = vshrl.u32 %v2511_v12, 16  ;;  %v2886_v4 = vld [vmem:[#allocation2 + $0x54] sm:$0xe] }
 0x105   : > { %v2609_v6 = vor.u32 %v2608_v23, %v5074_v41  ;;  %v2619_v13 = vrot.slane %v2617_v18, 4  ;;  %v2622_v43 = vrot.slane %v2620_v33, 5  ;;  %v2605_v26 = vsel %vm4513_vm13, %v5112_v2, %v5074_v41 }
 0x106   : > { %3936 = vmatmul.mubr.msk.bf16.gmra.mxu0 %vm921_vm12, %v4089_v37  ;;  %v5146_v37 = vsel %vm4632_vm0, %v3655_v32, %v2936_v35  ;;  %v2644_v22 = vshll.u32 %v2511_v12, 16  ;;  %v2650_v27 = vshll.u32 %v5140_v59, 16  ;;  %v2654_v48 = vshrl.u32 %v5140_v59, 16  ;;  %v2516_v35 = vld [vmem:[#allocation2 + $0x68] sm:$0x1] }
 0x107   : > { %3939 = vmatprep.mubr.msk.bf16.mxu0 %vm921_vm12, %v4090_v61  ;;  %v2610_v46 = vrot.slane %v2609_v6, 4  ;;  %v2623_v44 = vor.u32 %v2622_v43, %v2619_v13  ;;  %v2633_v61 = vor.u32 %v2632_v34, %v5119_v3  ;;  %v3656_v23 = vrot.slane %v2885_v16, 9 }
 0x108   : > { %v2945_v54 = vrot.slane %v2943_v50, 4  ;;  %v2665_v52 = vshrl.u32 %v2514_v0, 16  ;;  %v2668_v21 = vshll.u32 %v2514_v0, 16  ;;  %v2678_v19 = vshrl.u32 %v5155_v62, 16 }
 0x109   : > { %v2615_v41 = vsel %vm4513_vm13, %v2610_v46, %v2614_v55  ;;  %v2624_v10 = vrot.slane %v2623_v44, 4  ;;  %v2634_v15 = vrot.slane %v2633_v61, 4  ;;  %v2643_v33 = vrot.slane %v2641_v7, 4 }
 0x10a   : > { %3918 = vmatmul.mubr.msk.bf16.gmra.mxu1 %vm921_vm12, %v3607_v5  ;;  %v2557_v5 = vsel %vm4513_vm13, %v5066_v63, %v5035_v17  ;;  %v2591_v17 = vsel %vm4513_vm13, %v5096_v49, %v5094_v11  ;;  %v2939_v63 = vrot.slane %v5078_v9, 5  ;;  %v2646_v47 = vrot.slane %v2644_v22, 5 }
 0x10b   : > { %3921 = vmatprep.mubr.msk.bf16.mxu1 %vm921_vm12, %v3608_v1  ;;  %v2510_v1 = vld [vmem:[#allocation2 + $0x50] sm:$0x1]  ;;  %v5175_v60 = vrot.slane %v2650_v27, 5  ;;  %v2656_v39 = vrot.slane %v2654_v48, 4  ;;  %v2944_v42 = vsel %vm4632_vm0, %v3656_v23, %v2943_v50  ;;  %v2667_v11 = vrot.slane %v2665_v52, 4 }
 0x10c   : > { %v2636_v38 = vshll.u32 %v2510_v1, 16  ;;  %v2946_v40 = vrot.slane %v2510_v1, 5  ;;  %v2940_v9 = vsel %vm4632_vm0, %v2938_v8, %v2939_v63  ;;  %v2670_v49 = vrot.slane %v2668_v21, 5  ;;  %v2887_v50 = vld [vmem:[#allocation2 + $0x60] sm:$0xe] }
 0x10d   : > { %v2680_v6 = vrot.slane %v2678_v19, 4  ;;  %v3637_v30 = vcombine.low %v2581_v45, %v2591_v17  ;;  %v3638_v53 = vcombine.low %v2605_v26, %v2615_v41  ;;  %v3663_v2 = vcombine.low %v5146_v37, %v2940_v9  ;;  %v2519_v52 = vld [vmem:[#allocation2 + $0x74] sm:$0x1]  ;;  %v2888_v9 = vld [vmem:[#allocation2 + $0x6c] sm:$0xe] }
 0x10e   : > { %3940 = vmatmul.mubr.msk.bf16.gmra.mxu0 %vm921_vm12, %v4091_v56  ;;  %v2638_v18 = vrot.slane %v2636_v38, 5  ;;  %v2947_v14 = vsel %vm4632_vm0, %v2945_v54, %v2946_v40  ;;  %v2629_v32 = vsel %vm4513_vm13, %v2624_v10, %v5119_v3  ;;  %v2647_v13 = vor.u32 %v2646_v47, %v2643_v33 }
 0x10f   : > { %3963 = vmatprep.mubr.msk.bf16.mxu0 %vm921_vm12, %v3660_v57  ;;  %v2674_v57 = vshll.u32 %v5155_v62, 16  ;;  %v2657_v43 = vor.u32 %v2656_v39, %v5175_v60  ;;  %v2660_v34 = vshll.u32 %v2513_v29, 16  ;;  %v3657_v45 = vrot.slane %v2886_v4, 9 }
 0x110   : > { %v2639_v56 = vsel %vm4513_vm13, %v2634_v15, %v2638_v18  ;;  %v2953_v1 = vrot.slane %v2513_v29, 5  ;;  %v2957_v12 = vrot.slane %v5155_v62, 5  ;;  %v2671_v17 = vor.u32 %v2670_v49, %v2667_v11 }
 0x111   : > { %v5182_v20 = vrot.slane %v2674_v57, 5  ;;  %v2684_v55 = vshll.u32 %v2516_v35, 16  ;;  %v3639_v63 = vcombine.low %v2629_v32, %v2639_v56  ;;  %v2648_v16 = vrot.slane %v2647_v13, 4 }
 0x112   : > { %3922 = vmatmul.mubr.msk.bf16.gmra.mxu1 %vm921_vm12, %v3609_v25  ;;  %v3636_v25 = vcombine.low %v2557_v5, %v2567_v31  ;;  %v2517_v5 = vld [vmem:[#allocation2 + $0x6c] sm:$0xf]  ;;  %v2518_v31 = vld [vmem:[#allocation2 + $0x70] sm:$0xf]  ;;  %v2658_v26 = vrot.slane %v2657_v43, 4  ;;  %v2662_v44 = vrot.slane %v2660_v34, 5 }
 0x113   : > { %3945 = vmatprep.mubr.msk.bf16.mxu1 %vm921_vm12, %v5064_v36  ;;  %v2950_v36 = vrot.slane %v5140_v59, 5  ;;  %v2681_v46 = vor.u32 %v2680_v6, %v5182_v20  ;;  %v2689_v59 = vshrl.u32 %v2517_v5, 16  ;;  %v2698_v37 = vshll.u32 %v2518_v31, 16 }
 0x114   : > { %v2702_v8 = vshrl.u32 %v2518_v31, 16  ;;  %v3658_v38 = vrot.slane %v2887_v50, 9  ;;  %v2959_v0 = vrot.slane %v2957_v12, 4  ;;  %v2960_v62 = vrot.slane %v2516_v35, 5 }
 0x115   : > { %v2952_v3 = vrot.slane %v2950_v36, 4  ;;  %v2951_v61 = vsel %vm4632_vm0, %v3657_v45, %v2950_v36  ;;  %v2672_v22 = vrot.slane %v2671_v17, 4  ;;  %v2682_v27 = vrot.slane %v2681_v46, 4 }
 0x116   : > { %3964 = vmatmul.mubr.msk.bf16.vlgmr.msra.gmra.mxu0 %vm921_vm12, %v3661_v58  ;;  %v3664_v58 = vcombine.low %v2944_v42, %v2947_v14  ;;  %v2686_v48 = vrot.slane %v2684_v55, 5  ;;  %v2691_v41 = vrot.slane %v2689_v59, 4  ;;  %v2700_v54 = vrot.slane %v2698_v37, 5 }
 0x117   : > { %3967 = vmatprep.mubr.msk.bf16.mxu0 %vm921_vm12, %v3662_v51  ;;  %v2692_v51 = vshll.u32 %v2517_v5, 16  ;;  %v2954_v7 = vsel %vm4632_vm0, %v2952_v3, %v2953_v1  ;;  %v2704_v40 = vrot.slane %v2702_v8, 4  ;;  %v2964_v21 = vrot.slane %v2518_v31, 5 }
 0x118   : > { %v2958_v57 = vsel %vm4632_vm0, %v3658_v38, %v2957_v12  ;;  %v2961_v19 = vsel %vm4632_vm0, %v2959_v0, %v2960_v62  ;;  %v2653_v10 = vsel %vm4513_vm13, %v2648_v16, %v5175_v60  ;;  %v2663_v15 = vsel %vm4513_vm13, %v2658_v26, %v2662_v44 }
 0x119   : > { %v2694_v23 = vrot.slane %v2692_v51, 5  ;;  %v3665_v18 = vcombine.low %v2951_v61, %v2954_v7  ;;  %v2677_v33 = vsel %vm4513_vm13, %v2672_v22, %v5182_v20  ;;  %v2687_v47 = vsel %vm4513_vm13, %v2682_v27, %v2686_v48 }
 0x11a   : > { %3946 = vmatmul.mubr.msk.bf16.vlgmr.msra.gmra.mxu1 %vm921_vm12, %v3636_v25  ;;  %v2705_v25 = vor.u32 %v2704_v40, %v2700_v54  ;;  %v2708_v42 = vshll.u32 %v2519_v52, 16  ;;  %v3666_v14 = vcombine.low %v2958_v57, %v2961_v19  ;;  %v3659_v29 = vrot.slane %v2888_v9, 9 }
 0x11b   : > { %3949 = vmatprep.mubr.msk.bf16.mxu1 %vm921_vm12, %v3637_v30  ;;  %v2695_v39 = vor.u32 %v2694_v23, %v2691_v41  ;;  %v2966_v36 = vrot.slane %v2964_v21, 4  ;;  %v2967_v60 = vrot.slane %v2519_v52, 5  ;;  %v3640_v4 = vcombine.low %v2653_v10, %v2663_v15 }
 0x11c   : > { %v3641_v11 = vcombine.low %v2677_v33, %v2687_v47  ;;  %v2706_v6 = vrot.slane %v2705_v25, 4  ;;  %v2710_v30 = vrot.slane %v2708_v42, 5  ;;  %v2965_v20 = vsel %vm4632_vm0, %v3659_v29, %v2964_v21 }
 0x11d   : > { %v2696_v49 = vrot.slane %v2695_v39, 4  ;;  %vm3304_vm1 = vcmask 1040384   ;;  %vm3306_vm2 = vcmask 25600  }
 0x11e   : > { %3968 = vmatmul.mubr.msk.bf16.gmra.mxu0 %vm921_vm12, %v3663_v2  ;;  %v2711_v32 = vsel %vm4513_vm13, %v2706_v6, %v2710_v30 }
 0x11f   : > { %3971 = vmatprep.mubr.msk.bf16.mxu0 %vm921_vm12, %v3664_v58  ;;  %v2701_v2 = vsel %vm4513_vm13, %v2696_v49, %v2700_v54 }
 0x120   : > { %v3642_v56 = vcombine.low %v2701_v2, %v2711_v32 }
 0x122   : > { %3950 = vmatmul.mubr.msk.bf16.gmra.mxu1 %vm921_vm12, %v3638_v53  ;;  %v2968_v53 = vsel %vm4632_vm0, %v2966_v36, %v2967_v60 }
 0x123   : > { %3953 = vmatprep.mubr.msk.bf16.mxu1 %vm921_vm12, %v3639_v63  ;;  %v3667_v35 = vcombine.low %v2965_v20, %v2968_v53 }
 0x126   : > { %3972 = vmatmul.mubr.msk.bf16.gmra.mxu0 %vm921_vm12, %v3665_v18 }
 0x127   : > { %3975 = vmatprep.mubr.msk.bf16.mxu0 %vm921_vm12, %v3666_v14 }
 0x12a   : > { %3954 = vmatmul.mubr.msk.bf16.gmra.mxu1 %vm921_vm12, %v3640_v4 }
 0x12b   : > { %3957 = vmatprep.mubr.msk.bf16.mxu1 %vm921_vm12, %v3641_v11 }
 0x12e   : > { %3976 = vmatmul.mubr.msk.bf16.gmra.mxu0 %vm921_vm12, %v3667_v35 }
 0x132   : > { %3958 = vmatmul.mubr.msk.bf16.gmra.mxu1 %vm921_vm12, %v3642_v56 }
 0x15c   : > { %v3821_v13 = vpop.f32.mrf.mxu0 }
 0x15e   : > { %v984_v28 = vpop.f32.mrf.mxu0 }
 0x160   : > { %v3822_v5 = vpop.f32.mrf.mxu0 }
 0x161   : > { %v3829_v43 = vpop.f32.mrf.mxu1 }
 0x162   : > { %v987_v58 = vpop.f32.mrf.mxu0 }
 0x163   : > { %v1016_v34 = vpop.f32.mrf.mxu1 }
 0x165   : > { %v3830_v31 = vpop.f32.mrf.mxu1 }
 0x167   : > { %v1019_v45 = vpop.f32.mrf.mxu1 }
 0x16e   : > { %v3825_v1 = vpop.f32.mrf.mxu0 }
 0x170   : > { %v1000_v12 = vpop.f32.mrf.mxu0 }
 0x172   : > { %v3833_v3 = vpop.f32.mrf.mxu1  ;;  %v3826_v17 = vpop.f32.mrf.mxu0 }
 0x174   : > { %v1032_v24 = vpop.f32.mrf.mxu1  ;;  %v1003_v46 = vpop.f32.mrf.mxu0 }
 0x176   : > { %v3834_v55 = vpop.f32.mrf.mxu1  ;;  %v3857_v50 = vpop.f32.mrf.mxu0 }
 0x178   : > { %v5233_v59 = vpop.f32.mrf.mxu1  ;;  %v1380_v51 = vpop.f32.mrf.mxu0 }
 0x17a   : > { %v3839_v37 = vpop.f32.mrf.mxu1  ;;  %v3858_v63 = vpop.f32.mrf.mxu0 }
 0x17b   : > { %v1157_v8 = vadd.f32 %v3839_v37, %v3821_v13 }
 0x17c   : > { %v1148_v16 = vpop.f32.mrf.mxu1  ;;  %v1383_v61 = vpop.f32.mrf.mxu0 }
 0x17d   : > { %v5235_v26 = vadd.f32 %v3857_v50, %v1157_v8  ;;  %v1149_v44 = vadd.f32 %v1148_v16, %v984_v28 }
 0x17e   : > { %v3840_v38 = vpop.f32.mrf.mxu1  ;;  %v3861_v7 = vpop.f32.mrf.mxu0 }
 0x17f   : > { %v5237_v0 = vadd.f32 %v1380_v51, %v1149_v44  ;;  %v1160_v62 = vadd.f32 %v3840_v38, %v3822_v5 }
 0x180   : > { %v1151_v22 = vpop.f32.mrf.mxu1  ;;  %v1396_v41 = vpop.f32.mrf.mxu0 }
 0x181   : > { %v5239_v27 = vadd.f32 %v3858_v63, %v1160_v62  ;;  %v1152_v48 = vadd.f32 %v1151_v22, %v987_v58 }
 0x182   : > { %v3843_v23 = vpop.f32.mrf.mxu1  ;;  %v3862_v52 = vpop.f32.mrf.mxu0 }
 0x183   : > { %v5241_v54 = vadd.f32 %v1383_v61, %v1152_v48  ;;  %v1173_v40 = vadd.f32 %v3843_v23, %v3825_v1 }
 0x184   : > { %v1164_v21 = vpop.f32.mrf.mxu1  ;;  %v1399_v9 = vpop.f32.mrf.mxu0 }
 0x185   : > { %v5243_v57 = vadd.f32 %v3861_v7, %v1173_v40  ;;  %v1165_v19 = vadd.f32 %v1164_v21, %v1000_v12 }
 0x186   : > { %v3844_v10 = vpop.f32.mrf.mxu1  ;;  %v3865_v33 = vpop.f32.mrf.mxu0 }
 0x187   : > { %v5245_v15 = vadd.f32 %v1396_v41, %v1165_v19  ;;  %v1176_v18 = vadd.f32 %v3844_v10, %v3826_v17 }
 0x188   : > { %v1167_v47 = vpop.f32.mrf.mxu1  ;;  %v1412_v42 = vpop.f32.mrf.mxu0 }
 0x189   : > { %v5247_v39 = vadd.f32 %v3862_v52, %v1176_v18  ;;  %v1168_v25 = vadd.f32 %v1167_v47, %v1003_v46 }
 0x18a   : > { %v3847_v14 = vpop.f32.mrf.mxu1  ;;  %v3866_v60 = vpop.f32.mrf.mxu0 }
 0x18b   : > { %v5249_v29 = vadd.f32 %v1399_v9, %v1168_v25  ;;  %v1189_v36 = vadd.f32 %v3847_v14, %v3829_v43 }
 0x18c   : > { %v1180_v4 = vpop.f32.mrf.mxu1  ;;  %v1415_v6 = vpop.f32.mrf.mxu0 }
 0x18d   : > { %v5251_v11 = vadd.f32 %v3865_v33, %v1189_v36  ;;  %v1181_v49 = vadd.f32 %v1180_v4, %v1016_v34 }
 0x18e   : > { %v3848_v30 = vpop.f32.mrf.mxu1  ;;  %v3869_v2 = vpop.f32.mrf.mxu0 }
 0x18f   : > { %v5253_v20 = vadd.f32 %v1412_v42, %v1181_v49  ;;  %v1192_v53 = vadd.f32 %v3848_v30, %v3830_v31 }
 0x190   : > { %v1183_v32 = vpop.f32.mrf.mxu1  ;;  %v1428_v13 = vpop.f32.mrf.mxu0 }
 0x191   : > { %v5255_v35 = vadd.f32 %v3866_v60, %v1192_v53  ;;  %v1184_v56 = vadd.f32 %v1183_v32, %v1019_v45 }
 0x192   : > { %v3851_v28 = vpop.f32.mrf.mxu1  ;;  %v3870_v58 = vpop.f32.mrf.mxu0 }
 0x193   : > { %v5257_v5 = vadd.f32 %v1415_v6, %v1184_v56  ;;  %v1205_v43 = vadd.f32 %v3851_v28, %v3833_v3 }
 0x194   : > { %v1196_v1 = vpop.f32.mrf.mxu1  ;;  %v1431_v17 = vpop.f32.mrf.mxu0 }
 0x195   : > { %v5259_v12 = vadd.f32 %v3869_v2, %v1205_v43  ;;  %v1197_v34 = vadd.f32 %v1196_v1, %v1032_v24 }
 0x196   : > { %v3852_v46 = vpop.f32.mrf.mxu1  ;;  %v5263_v51 = vpop.f32.mrf.mxu0 }
 0x197   : > { %v5261_v50 = vadd.f32 %v1428_v13, %v1197_v34  ;;  %v1208_v31 = vadd.f32 %v3852_v46, %v3834_v55 }
 0x198   : > { %v1199_v37 = vpop.f32.mrf.mxu1  ;;  %v5268_v63 = vpop.f32.mrf.mxu0 }
 0x199   : > { %v5265_v8 = vadd.f32 %v3870_v58, %v1208_v31  ;;  %v1200_v45 = vadd.f32 %v1199_v37, %v5233_v59 }
 0x19a   : > { %v3875_v3 = vpop.f32.mrf.mxu1  ;;  %v5272_v44 = vpop.f32.mrf.mxu0 }
 0x19b   : > { %v5270_v16 = vadd.f32 %v1431_v17, %v1200_v45 }
 0x19c   : > { %v1581_v24 = vpop.f32.mrf.mxu1  ;;  %v5274_v61 = vpop.f32.mrf.mxu0 }
 0x19e   : > { %v3876_v38 = vpop.f32.mrf.mxu1  ;;  %v5276_v62 = vpop.f32.mrf.mxu0 }
 0x1a0   : > { %v1584_v55 = vpop.f32.mrf.mxu1  ;;  %v5278_v7 = vpop.f32.mrf.mxu0 }
 0x1a2   : > { %v3879_v22 = vpop.f32.mrf.mxu1  ;;  %v5280_v48 = vpop.f32.mrf.mxu0 }
 0x1a4   : > { %v1597_v59 = vpop.f32.mrf.mxu1  ;;  %v5282_v41 = vpop.f32.mrf.mxu0 }
 0x1a6   : > { %v3880_v23 = vpop.f32.mrf.mxu1  ;;  %v5284_v40 = vpop.f32.mrf.mxu0 }
 0x1a8   : > { %v1600_v52 = vpop.f32.mrf.mxu1  ;;  %v5286_v21 = vpop.f32.mrf.mxu0 }
 0x1aa   : > { %v3883_v19 = vpop.f32.mrf.mxu1  ;;  %v5288_v9 = vpop.f32.mrf.mxu0 }
 0x1ac   : > { %v1613_v10 = vpop.f32.mrf.mxu1  ;;  %v5290_v18 = vpop.f32.mrf.mxu0 }
 0x1ae   : > { %v3884_v33 = vpop.f32.mrf.mxu1  ;;  %v5292_v47 = vpop.f32.mrf.mxu0 }
 0x1b0   : > { %v1616_v25 = vpop.f32.mrf.mxu1  ;;  %v5294_v42 = vpop.f32.mrf.mxu0 }
 0x1b2   : > { %v3887_v14 = vpop.f32.mrf.mxu1  ;;  %v5296_v36 = vpop.f32.mrf.mxu0 }
 0x1b4   : > { %v1629_v60 = vpop.f32.mrf.mxu1  ;;  %v5298_v4 = vpop.f32.mrf.mxu0 }
 0x1b5   : > { %5576 = vst [vmem:[#allocation7_spill] sm:$0xff] %v5298_v4 }
 0x1b6   : > { %v3888_v49 = vpop.f32.mrf.mxu1  ;;  %v3929_v6 = vpop.f32.mrf.mxu0 }
 0x1b8   : > { %v1632_v30 = vpop.f32.mrf.mxu1  ;;  %v5300_v53 = vpop.f32.mrf.mxu0 }
 0x1ba   : > { %v3911_v2 = vpop.f32.mrf.mxu1  ;;  %v5302_v32 = vpop.f32.mrf.mxu0 }
 0x1bb   : > { %5577 = vst [vmem:[#allocation8_spill] sm:$0xff] %v5302_v32 }
 0x1bc   : > { %v2219_v56 = vpop.f32.mrf.mxu1  ;;  %v5304_v13 = vpop.f32.mrf.mxu0 }
 0x1bd   : > { %5578 = vst [vmem:[#allocation9_spill] sm:$0xff] %v5304_v13 }
 0x1be   : > { %v3912_v28 = vpop.f32.mrf.mxu1  ;;  %v5306_v43 = vpop.f32.mrf.mxu0 }
 0x1bf   : > { %5579 = vst [vmem:[#allocation10_spill] sm:$0xff] %v5306_v43 }
 0x1c0   : > { %v2222_v58 = vpop.f32.mrf.mxu1  ;;  %v5308_v1 = vpop.f32.mrf.mxu0 }
 0x1c1   : > { %5580 = vst [vmem:[#allocation11_spill] sm:$0xff] %v5308_v1 }
 0x1c2   : > { %v5310_v34 = vpop.f32.mrf.mxu1  ;;  %v5312_v17 = vpop.f32.mrf.mxu0 }
 0x1c3   : > { %5581 = vst [vmem:[#allocation12_spill] sm:$0xff] %v5310_v34  ;;  %5582 = vst [vmem:[#allocation13_spill] sm:$0xff] %v5312_v17 }
 0x1c4   : > { %v5314_v46 = vpop.f32.mrf.mxu1  ;;  %v5316_v31 = vpop.f32.mrf.mxu0 }
 0x1c5   : > { %5583 = vst [vmem:[#allocation14_spill] sm:$0xff] %v5314_v46  ;;  %5584 = vst [vmem:[#allocation15_spill] sm:$0xff] %v5316_v31  ;;  %v1646_v31 = vadd.f32 %v3875_v3, %v5235_v26 }
 0x1c6   : > { %v5318_v37 = vpop.f32.mrf.mxu1  ;;  %v5320_v45 = vpop.f32.mrf.mxu0 }
 0x1c7   : > { %5585 = vst [vmem:[#allocation16_spill] sm:$0xff] %v5318_v37  ;;  %5586 = vst [vmem:[#allocation17_spill] sm:$0xff] %v5320_v45  ;;  %v1644_v45 = vadd.f32 %v1581_v24, %v5237_v0  ;;  %v1648_v0 = vadd.f32 %v1597_v59, %v5245_v15  ;;  %v1651_v24 = vadd.f32 %v3880_v23, %v5247_v39 }
 0x1c8   : > { %v5322_v32 = vpop.f32.mrf.mxu1  ;;  %v5324_v13 = vpop.f32.mrf.mxu0  ;;  %v1653_v39 = vadd.f32 %v1616_v25, %v5257_v5 }
 0x1c9   : > { %5587 = vst [vmem:[#allocation18_spill] sm:$0xff] %v5322_v32  ;;  %5588 = vst [vmem:[#allocation19_spill] sm:$0xff] %v5324_v13  ;;  %v1647_v13 = vadd.f32 %v3876_v38, %v5239_v27  ;;  %v2025_v26 = vadd.f32 %v5268_v63, %v1644_v45  ;;  %v1649_v27 = vadd.f32 %v1600_v52, %v5249_v29 }
 0x1ca   : > { %v5326_v43 = vpop.f32.mrf.mxu1  ;;  %v5328_v4 = vpop.f32.mrf.mxu0  ;;  %v1655_v63 = vadd.f32 %v3884_v33, %v5255_v35  ;;  %v1658_v29 = vadd.f32 %v3887_v14, %v5259_v12  ;;  %v2029_v52 = vadd.f32 %v5278_v7, %v1648_v0  ;;  %v2032_v35 = vadd.f32 %v5280_v48, %v1651_v24 }
 0x1cb   : > { %5589 = vst [vmem:[#allocation20_spill] sm:$0xff] %v5326_v43  ;;  %5590 = vst [vmem:[#allocation21_spill] sm:$0xff] %v5328_v4  ;;  %v1645_v4 = vadd.f32 %v1584_v55, %v5241_v54  ;;  %v1654_v54 = vadd.f32 %v3883_v19, %v5251_v11  ;;  %v2282_v11 = vadd.f32 %v2219_v56, %v2025_v26 }
 0x1cc   : > { %v5330_v1 = vpop.f32.mrf.mxu1  ;;  %v5332_v34 = vpop.f32.mrf.mxu0  ;;  %v2036_v7 = vadd.f32 %v5288_v9, %v1655_v63  ;;  %v5595_v9 = vld [vmem:[#allocation12_spill] sm:$0xff]  ;;  %v5604_v63 = vld [vmem:[#allocation10_spill] sm:$0xff] }
 0x1cd   : > { %5591 = vst [vmem:[#allocation22_spill] sm:$0xff] %v5330_v1  ;;  %5592 = vst [vmem:[#allocation23_spill] sm:$0xff] %v5332_v34  ;;  %v2027_v34 = vadd.f32 %v5263_v51, %v1646_v31  ;;  %v2028_v51 = vadd.f32 %v5272_v44, %v1647_v13  ;;  %v1656_v44 = vadd.f32 %v1629_v60, %v5261_v50 }
 0x1ce   : > { %v5334_v17 = vpop.f32.mrf.mxu1  ;;  %v5337_v46 = vpop.f32.mrf.mxu0  ;;  %v2035_v5 = vadd.f32 %v5284_v40, %v1654_v54  ;;  %v2480_v60 = vadd.f32 %v5300_v53, %v2282_v11 }
 0x1cf   : > { %5593 = vst [vmem:[#allocation24_spill] sm:$0xff] %v5334_v17  ;;  %v1650_v17 = vadd.f32 %v3879_v22, %v5243_v57  ;;  %v2284_v38 = vadd.f32 %v3911_v2, %v2027_v34  ;;  %v2026_v57 = vadd.f32 %v5274_v61, %v1645_v4  ;;  %v1652_v22 = vadd.f32 %v1613_v10, %v5253_v20  ;;  %v5596_v2 = vld [vmem:[#allocation14_spill] sm:$0xff] }
 0x1d0   : > { %v5340_v37 = vpop.f32.mrf.mxu1  ;;  %v5342_v32 = vpop.f32.mrf.mxu0  ;;  %v1659_v61 = vadd.f32 %v3888_v49, %v5265_v8  ;;  %v1657_v20 = vadd.f32 %v1632_v30, %v5270_v16  ;;  %v2285_v25 = vadd.f32 %v3912_v28, %v2028_v51  ;;  %v2034_v8 = vadd.f32 %v5290_v18, %v1653_v39  ;;  %v5594_v49 = vld [vmem:[#allocation7_spill] sm:$0xff]  ;;  %v5597_v18 = vld [vmem:[#allocation16_spill] sm:$0xff]  ;;  %v5600_v31 = vld [vmem:[#allocation18_spill] sm:$0xff] }
 0x1d1   : > { %v2031_v59 = vadd.f32 %v5276_v62, %v1650_v17  ;;  %v2030_v62 = vadd.f32 %v5282_v41, %v1649_v27  ;;  %v2482_v10 = vadd.f32 %v3929_v6, %v2284_v38  ;;  %v2033_v33 = vadd.f32 %v5286_v21, %v1652_v22  ;;  %v5599_v17 = vld [vmem:[#allocation9_spill] sm:$0xff] }
 0x1d2   : > { %v5346_v43 = vpop.f32.mrf.mxu1  ;;  %v5350_v1 = vpop.f32.mrf.mxu0  ;;  %v2283_v50 = vadd.f32 %v2222_v58, %v2026_v57  ;;  %v2039_v16 = vadd.f32 %v5292_v47, %v1658_v29  ;;  %v2037_v41 = vadd.f32 %v5294_v42, %v1656_v44  ;;  %v5386_v40 = vadd.f32 %v5296_v36, %v1659_v61  ;;  %v5598_v58 = vld [vmem:[#allocation8_spill] sm:$0xff]  ;;  %v5606_v61 = vld [vmem:[#allocation13_spill] sm:$0xff] }
 0x1d3   : > { %v5389_v21 = vadd.f32 %v5594_v49, %v1657_v20  ;;  %v2288_v6 = vadd.f32 %v5595_v9, %v2031_v59  ;;  %v2286_v56 = vadd.f32 %v5596_v2, %v2029_v52  ;;  %v2289_v13 = vadd.f32 %v5597_v18, %v2032_v35  ;;  %v5601_v45 = vld [vmem:[#allocation20_spill] sm:$0xff]  ;;  %v5605_v52 = vld [vmem:[#allocation11_spill] sm:$0xff] }
 0x1d4   : > { %v5354_v3 = vpop.f32.mrf.mxu1  ;;  %v5359_v55 = vpop.f32.mrf.mxu0  ;;  %v2483_v34 = vadd.f32 %v5598_v58, %v2285_v25  ;;  %v2481_v42 = vadd.f32 %v5599_v17, %v2283_v50  ;;  %v2287_v36 = vadd.f32 %v5600_v31, %v2030_v62  ;;  %v2292_v26 = vadd.f32 %v5601_v45, %v2035_v5  ;;  %v5602_v24 = vld [vmem:[#allocation22_spill] sm:$0xff]  ;;  %v5609_v50 = vld [vmem:[#allocation19_spill] sm:$0xff] }
 0x1d5   : > { %v2290_v27 = vadd.f32 %v5602_v24, %v2033_v33  ;;  %v2486_v59 = vadd.f32 %v5604_v63, %v2288_v6  ;;  %v2291_v39 = vadd.f32 %v5340_v37, %v2034_v8  ;;  %v2296_v29 = vadd.f32 %v5346_v43, %v2039_v16  ;;  %v5608_v33 = vld [vmem:[#allocation17_spill] sm:$0xff] }
 0x1d6   : > { %v5365_v15 = vpop.f32.mrf.mxu1  ;;  %v3965_v23 = vpop.f32.mrf.mxu0  ;;  %v5603_v54 = vld [vmem:[#allocation24_spill] sm:$0xff]  ;;  %v2484_v44 = vadd.f32 %v5605_v52, %v2286_v56  ;;  %v2487_v20 = vadd.f32 %v5606_v61, %v2289_v13  ;;  %v2294_v35 = vadd.f32 %v5354_v3, %v2037_v41  ;;  %v5610_v8 = vld [vmem:[#allocation21_spill] sm:$0xff]  ;;  %v5611_v41 = vld [vmem:[#allocation23_spill] sm:$0xff] }
 0x1d7   : > { %v2293_v38 = vadd.f32 %v5603_v54, %v2036_v7  ;;  %v2490_v7 = vadd.f32 %v5608_v33, %v2292_v26  ;;  %v5419_v49 = vadd.f32 %v5611_v41, %v2291_v39  ;;  %v5422_v9 = vadd.f32 %v5337_v46, %v2296_v29 }
 0x1d8   : > { %v5374_v19 = vpop.f32.mrf.mxu1  ;;  %v3055_v12 = vpop.f32.mrf.mxu0  ;;  %v5425_v2 = vadd.f32 %v5342_v32, %v2294_v35  ;;  %v2297_v41 = vadd.f32 %v5365_v15, %v5386_v40 }
 0x1d9   : > { %v5414_v16 = vadd.f32 %v5610_v8, %v2293_v38  ;;  %v2295_v15 = vadd.f32 %v5374_v19, %v5389_v21 }
 0x1da   : > { %v3947_v14 = vpop.f32.mrf.mxu1  ;;  %v3966_v4 = vpop.f32.mrf.mxu0 }
 0x1db   : > { %v2867_v48 = vadd.f32 %v3947_v14, %v2482_v10  ;;  %v5607_v10 = vld [vmem:[#allocation15_spill] sm:$0xff]  ;;  %v5411_v14 = vadd.f32 %v5609_v50, %v2290_v27 }
 0x1dc   : > { %v2802_v30 = vpop.f32.mrf.mxu1  ;;  %v3058_v53 = vpop.f32.mrf.mxu0 }
 0x1dd   : > { %v3120_v47 = vadd.f32 %v3965_v23, %v2867_v48  ;;  %v2865_v28 = vadd.f32 %v2802_v30, %v2480_v60 }
 0x1de   : > { %v3948_v0 = vpop.f32.mrf.mxu1  ;;  %v3969_v22 = vpop.f32.mrf.mxu0 }
 0x1df   : > { %v3722_v51 = vpack.c.bf16 %v3120_v47, %v3120_v47  ;;  %v3118_v57 = vadd.f32 %v3055_v12, %v2865_v28  ;;  %v2868_v11 = vadd.f32 %v3948_v0, %v2483_v34  ;;  %v2485_v12 = vadd.f32 %v5607_v10, %v2287_v36 }
 0x1e0   : > { %v2805_v23 = vpop.f32.mrf.mxu1  ;;  %v3071_v5 = vpop.f32.mrf.mxu0  ;;  %v3253_v56 = vmul.f32 %v3120_v47, %v3120_v47 }
 0x1e1   : > { %3200 = vst.msk [vmem:[%s4359_s10 + $0x8] sm:$0xf] %vm505_vm5, %v3722_v51  ;;  %v3720_v62 = vpack.c.bf16 %v3118_v57, %v3118_v57  ;;  %v3121_v37 = vadd.f32 %v3966_v4, %v2868_v11  ;;  %v2866_v25 = vadd.f32 %v2805_v23, %v2481_v42  ;;  %v3251_v3 = vmul.f32 %v3118_v57, %v3118_v57 }
 0x1e2   : > { %v3951_v43 = vpop.f32.mrf.mxu1  ;;  %v3970_v48 = vpop.f32.mrf.mxu0  ;;  %v3214_v58 = vsel %vm921_vm12, %v3118_v57, 0.0  ;;  %v3270_v38 = vsel %vm921_vm12, %v3253_v56, 0.0 }
 0x1e3   : > { %3198 = vst.msk [vmem:[%s4359_s10] sm:$0xf] %vm505_vm5, %v3720_v62  ;;  %v2871_v60 = vadd.f32 %v3951_v43, %v2486_v59  ;;  %v3723_v4 = vpack.c.bf16 %v3121_v37, %v3121_v37  ;;  %v3119_v6 = vadd.f32 %v3058_v53, %v2866_v25  ;;  %v3217_v53 = vsel %vm921_vm12, %v3120_v47, 0.0 }
 0x1e4   : > { %v2818_v30 = vpop.f32.mrf.mxu1  ;;  %v3074_v28 = vpop.f32.mrf.mxu0  ;;  %v3267_v32 = vsel %vm921_vm12, %v3251_v3, 0.0  ;;  %v3254_v26 = vmul.f32 %v3121_v37, %v3121_v37  ;;  %v3219_v63 = vsel %vm921_vm12, %v3121_v37, 0.0 }
 0x1e5   : > { %v3124_v18 = vadd.f32 %v3969_v22, %v2871_v60  ;;  %v2869_v13 = vadd.f32 %v2818_v30, %v2484_v44  ;;  %3201 = vst.msk [vmem:[%s4359_s10 + $0xc] sm:$0xf] %vm505_vm5, %v3723_v4  ;;  %v3721_v34 = vpack.c.bf16 %v3119_v6, %v3119_v6  ;;  %v3215_v17 = vsel %vm921_vm12, %v3119_v6, 0.0 }
 0x1e6   : > { %v3252_v46 = vmul.f32 %v3119_v6, %v3119_v6  ;;  %v3952_v42 = vpop.f32.mrf.mxu1  ;;  %v3216_v31 = vadd.f32 %v3215_v17, %v3214_v58  ;;  %v3973_v45 = vpop.f32.mrf.mxu0  ;;  %v3272_v35 = vsel %vm921_vm12, %v3254_v26, 0.0 }
 0x1e7   : > { %v3726_v36 = vpack.c.bf16 %v3124_v18, %v3124_v18  ;;  %3199 = vst.msk [vmem:[%s4359_s10 + $0x4] sm:$0xf] %vm505_vm5, %v3721_v34  ;;  %v3122_v24 = vadd.f32 %v3071_v5, %v2869_v13  ;;  %v2872_v27 = vadd.f32 %v3952_v42, %v2487_v20  ;;  %v3257_v62 = vmul.f32 %v3124_v18, %v3124_v18 }
 0x1e8   : > { %v3268_v0 = vsel %vm921_vm12, %v3252_v46, 0.0  ;;  %v2821_v54 = vpop.f32.mrf.mxu1  ;;  %v3218_v51 = vadd.f32 %v3217_v53, %v3216_v31  ;;  %v3087_v22 = vpop.f32.mrf.mxu0  ;;  %v3225_v13 = vsel %vm921_vm12, %v3124_v18, 0.0  ;;  %v2495_v31 = vadd.f32 %v5350_v1, %v2297_v41 }
 0x1e9   : > { %v3269_v57 = vadd.f32 %v3268_v0, %v3267_v32  ;;  %3204 = vst.msk [vmem:[%s4359_s10 + $0x18] sm:$0xf] %vm505_vm5, %v3726_v36  ;;  %v2870_v47 = vadd.f32 %v2821_v54, %v2485_v12  ;;  %v3724_v59 = vpack.c.bf16 %v3122_v24, %v3122_v24  ;;  %v3255_v39 = vmul.f32 %v3122_v24, %v3122_v24 }
 0x1ea   : > { %v3125_v29 = vadd.f32 %v3970_v48, %v2872_v27  ;;  %v3955_v11 = vpop.f32.mrf.mxu1  ;;  %v3220_v52 = vadd.f32 %v3219_v63, %v3218_v51  ;;  %v3974_v20 = vpop.f32.mrf.mxu0  ;;  %v3221_v5 = vsel %vm921_vm12, %v3122_v24, 0.0  ;;  %v3278_v40 = vsel %vm921_vm12, %v3257_v62, 0.0 }
 0x1eb   : > { %v3271_v23 = vadd.f32 %v3270_v38, %v3269_v57  ;;  %v3123_v44 = vadd.f32 %v3074_v28, %v2870_v47  ;;  %v2875_v61 = vadd.f32 %v3955_v11, %v2490_v7  ;;  %3202 = vst.msk [vmem:[%s4359_s10 + $0x10] sm:$0xf] %vm505_vm5, %v3724_v59  ;;  %v3274_v8 = vsel %vm921_vm12, %v3255_v39, 0.0 }
 0x1ec   : > { %v3727_v10 = vpack.c.bf16 %v3125_v29, %v3125_v29  ;;  %v2834_v12 = vpop.f32.mrf.mxu1  ;;  %v3222_v33 = vadd.f32 %v3221_v5, %v3220_v52  ;;  %v3090_v50 = vpop.f32.mrf.mxu0  ;;  %v3258_v28 = vmul.f32 %v3125_v29, %v3125_v29  ;;  %v2493_v1 = vadd.f32 %v5359_v55, %v2295_v15 }
 0x1ed   : > { %v3273_v37 = vadd.f32 %v3272_v35, %v3271_v23  ;;  %v3725_v25 = vpack.c.bf16 %v3123_v44, %v3123_v44  ;;  %v3223_v43 = vsel %vm921_vm12, %v3123_v44, 0.0  ;;  %v3256_v7 = vmul.f32 %v3123_v44, %v3123_v44 }
 0x1ee   : > { %3205 = vst.msk [vmem:[%s4359_s10 + $0x1c] sm:$0xf] %vm505_vm5, %v3727_v10  ;;  %v3128_v3 = vadd.f32 %v3973_v45, %v2875_v61  ;;  %v2873_v60 = vadd.f32 %v2834_v12, %v5411_v14  ;;  %v3956_v48 = vpop.f32.mrf.mxu1  ;;  %v3224_v6 = vadd.f32 %v3223_v43, %v3222_v33  ;;  %v3977_v56 = vpop.f32.mrf.mxu0  ;;  %v3280_v24 = vsel %vm921_vm12, %v3258_v28, 0.0 }
 0x1ef   : > { %v3275_v4 = vadd.f32 %v3274_v8, %v3273_v37  ;;  %3203 = vst.msk [vmem:[%s4359_s10 + $0x14] sm:$0xf] %vm505_vm5, %v3725_v25  ;;  %v2876_v30 = vadd.f32 %v3956_v48, %v5414_v16  ;;  %v3276_v58 = vsel %vm921_vm12, %v3256_v7, 0.0  ;;  %v3227_v16 = vsel %vm921_vm12, %v3125_v29, 0.0 }
 0x1f0   : > { %v3730_v34 = vpack.c.bf16 %v3128_v3, %v3128_v3  ;;  %v2837_v17 = vpop.f32.mrf.mxu1  ;;  %v3226_v14 = vadd.f32 %v3225_v13, %v3224_v6  ;;  %v3126_v42 = vadd.f32 %v3087_v22, %v2873_v60  ;;  %v3103_v0 = vpop.f32.mrf.mxu0  ;;  %v3261_v47 = vmul.f32 %v3128_v3, %v3128_v3 }
 0x1f1   : > { %v3277_v46 = vadd.f32 %v3276_v58, %v3275_v4  ;;  %v3129_v53 = vadd.f32 %v3974_v20, %v2876_v30  ;;  %v2874_v18 = vadd.f32 %v2837_v17, %v5419_v49  ;;  %v3233_v35 = vsel %vm921_vm12, %v3128_v3, 0.0 }
 0x1f2   : > { %3208 = vst.msk [vmem:[%s4359_s10 + $0x28] sm:$0xf] %vm505_vm5, %v3730_v34  ;;  %v3959_v32 = vpop.f32.mrf.mxu1  ;;  %v3728_v45 = vpack.c.bf16 %v3126_v42, %v3126_v42  ;;  %v3228_v26 = vadd.f32 %v3227_v16, %v3226_v14  ;;  %v3229_v19 = vsel %vm921_vm12, %v3126_v42, 0.0  ;;  %v3259_v21 = vmul.f32 %v3126_v42, %v3126_v42  ;;  %v3978_v52 = vpop.f32.mrf.mxu0 }
 0x1f3   : > { %v3279_v36 = vadd.f32 %v3278_v40, %v3277_v46  ;;  %v3731_v27 = vpack.c.bf16 %v3129_v53, %v3129_v53  ;;  %v3127_v49 = vadd.f32 %v3090_v50, %v2874_v18  ;;  %v2879_v57 = vadd.f32 %v3959_v32, %v5422_v9 }
 0x1f4   : > { %v2850_v54 = vpop.f32.mrf.mxu1  ;;  %3206 = vst.msk [vmem:[%s4359_s10 + $0x20] sm:$0xf] %vm505_vm5, %v3728_v45  ;;  %v3230_v38 = vadd.f32 %v3229_v19, %v3228_v26  ;;  %v3282_v22 = vsel %vm921_vm12, %v3259_v21, 0.0  ;;  %v3262_v62 = vmul.f32 %v3129_v53, %v3129_v53  ;;  %v3286_v37 = vsel %vm921_vm12, %v3261_v47, 0.0  ;;  %v3106_v8 = vpop.f32.mrf.mxu0 }
 0x1f5   : > { %v3281_v51 = vadd.f32 %v3280_v24, %v3279_v36  ;;  %3209 = vst.msk [vmem:[%s4359_s10 + $0x2c] sm:$0xf] %vm505_vm5, %v3731_v27  ;;  %v2877_v63 = vadd.f32 %v2850_v54, %v5425_v2  ;;  %v3729_v29 = vpack.c.bf16 %v3127_v49, %v3127_v49  ;;  %v3231_v11 = vsel %vm921_vm12, %v3127_v49, 0.0 }
 0x1f6   : > { %v3960_v59 = vpop.f32.mrf.mxu1  ;;  %v3260_v23 = vmul.f32 %v3127_v49, %v3127_v49  ;;  %v3232_v44 = vadd.f32 %v3231_v11, %v3230_v38  ;;  %v3132_v61 = vadd.f32 %v3977_v56, %v2879_v57  ;;  %v3235_v25 = vsel %vm921_vm12, %v3129_v53, 0.0 }
 0x1f7   : > { %v3283_v39 = vadd.f32 %v3282_v22, %v3281_v51  ;;  %v3130_v9 = vadd.f32 %v3103_v0, %v2877_v63  ;;  %v2880_v20 = vadd.f32 %v3960_v59, %v2495_v31  ;;  %3207 = vst.msk [vmem:[%s4359_s10 + $0x24] sm:$0xf] %vm505_vm5, %v3729_v29  ;;  %v3288_v41 = vsel %vm921_vm12, %v3262_v62, 0.0 }
 0x1f8   : > { %v2853_v55 = vpop.f32.mrf.mxu1  ;;  %v3284_v2 = vsel %vm921_vm12, %v3260_v23, 0.0  ;;  %v3234_v10 = vadd.f32 %v3233_v35, %v3232_v44  ;;  %v3734_v33 = vpack.c.bf16 %v3132_v61, %v3132_v61  ;;  %v3265_v6 = vmul.f32 %v3132_v61, %v3132_v61 }
 0x1f9   : > { %v2878_v5 = vadd.f32 %v2853_v55, %v2493_v1  ;;  %v3285_v12 = vadd.f32 %v3284_v2, %v3283_v39  ;;  %v3732_v43 = vpack.c.bf16 %v3130_v9, %v3130_v9  ;;  %v3263_v50 = vmul.f32 %v3130_v9, %v3130_v9 }
 0x1fa   : > { %3212 = vst.msk [vmem:[%s4359_s10 + $0x38] sm:$0xf] %vm505_vm5, %v3734_v33  ;;  %v3236_v3 = vadd.f32 %v3235_v25, %v3234_v10  ;;  %v3133_v60 = vadd.f32 %v3978_v52, %v2880_v20  ;;  %v3237_v4 = vsel %vm921_vm12, %v3130_v9, 0.0  ;;  %v3241_v42 = vsel %vm921_vm12, %v3132_v61, 0.0 }
 0x1fb   : > { %v3287_v7 = vadd.f32 %v3286_v37, %v3285_v12  ;;  %v3131_v48 = vadd.f32 %v3106_v8, %v2878_v5  ;;  %3210 = vst.msk [vmem:[%s4359_s10 + $0x30] sm:$0xf] %vm505_vm5, %v3732_v43  ;;  %v3290_v28 = vsel %vm921_vm12, %v3263_v50, 0.0  ;;  %v3294_v18 = vsel %vm921_vm12, %v3265_v6, 0.0 }
 0x1fc   : > { %v3238_v30 = vadd.f32 %v3237_v4, %v3236_v3  ;;  %v3735_v13 = vpack.c.bf16 %v3133_v60, %v3133_v60  ;;  %v3266_v53 = vmul.f32 %v3133_v60, %v3133_v60  ;;  %v3243_v32 = vsel %vm921_vm12, %v3133_v60, 0.0 }
 0x1fd   : > { %v3289_v56 = vadd.f32 %v3288_v41, %v3287_v7  ;;  %v3733_v58 = vpack.c.bf16 %v3131_v48, %v3131_v48  ;;  %v3239_v34 = vsel %vm921_vm12, %v3131_v48, 0.0  ;;  %v3264_v17 = vmul.f32 %v3131_v48, %v3131_v48 }
 0x1fe   : > { %3213 = vst.msk [vmem:[%s4359_s10 + $0x3c] sm:$0xf] %vm505_vm5, %v3735_v13  ;;  %v3240_v46 = vadd.f32 %v3239_v34, %v3238_v30  ;;  %v3296_v45 = vsel %vm921_vm12, %v3266_v53, 0.0 }
 0x1ff   : > { %v3291_v14 = vadd.f32 %v3290_v28, %v3289_v56  ;;  %3211 = vst.msk [vmem:[%s4359_s10 + $0x34] sm:$0xf] %vm505_vm5, %v3733_v58  ;;  %v3292_v15 = vsel %vm921_vm12, %v3264_v17, 0.0  ;;  %s3693_s10 = sshll.u32 %s4172_s16, 1 }
 0x200   : > { %v3242_v40 = vadd.f32 %v3241_v42, %v3240_v46  ;;  %s3334_s28 = sadd.s32 %s4168_s15, %s3693_s10  ;;  %s5612_s15 = sand.u32 1, %s4160_s13  }
 0x201   : > { %v3293_v16 = vadd.f32 %v3292_v15, %v3291_v14  ;;  %s3694_s29 = sshll.u32 %s3334_s28, 5  ;;  %s3319_s9 = scalar_lea.sflag [#allocation4], %s5612_s15 }
 0x202   : > { %v3244_v31 = vadd.f32 %v3243_v32, %v3242_v40  ;;  %s5505_s16 = scalar_lea.hbm %s5558_s3, %s3694_s29 }
 0x203   : > { %v3295_v36 = vadd.f32 %v3294_v18, %v3293_v16 }
 0x204   : > { %v3245_v26 = vrot.slane %v3244_v31, 4 }
 0x205   : > { %v3297_v0 = vadd.f32 %v3296_v45, %v3295_v36 }
 0x206   : > { %v3246_v24 = vadd.f32 %v3245_v26, %v3244_v31 }
 0x207   : > { %v3298_v19 = vrot.slane %v3297_v0, 4 }
 0x208   : > { %v3247_v21 = vrot.slane %v3246_v24, 2 }
 0x209   : > { %v3299_v27 = vadd.f32 %v3298_v19, %v3297_v0 }
 0x20a   : > { %v3248_v54 = vadd.f32 %v3247_v21, %v3246_v24 }
 0x20b   : > { %v3300_v38 = vrot.slane %v3299_v27, 2 }
 0x20c   : > { %v3249_v51 = vrot.slane %v3248_v54, 1 }
 0x20d   : > { %v3301_v49 = vadd.f32 %v3300_v38, %v3299_v27 }
 0x20e   : > { %v3250_v1 = vadd.f32 %v3249_v51, %v3248_v54 }
 0x20f   : > { %v3302_v57 = vrot.slane %v3301_v49, 1 }
 0x211   : > { %v3303_v47 = vadd.f32 %v3302_v57, %v3301_v49 }
 0x213   : > { %v3305_v22 = vsel %vm3304_vm1, %v3250_v1, %v3303_v47 }
 0x214   : > { %3307 = vst.msk [vmem:[%s192_s23] sm:$0x3] %vm3306_vm2, %v3305_v22 }
 0x215   : > { %4105 = shalt.err (!%p4102_p12)
}
 0x216   : > { %s4106_s5 = scalar_lea.hbm %s5505_s16, 32  ;;  %s4110_s27 = scalar_lea.hbm %s5558_s3, 128 }
 0x217   : > { %p4107_p13 = scmp.ne.s32.totalorder %s5505_s16, %s4106_s5  ;;  %p4111_p2 = scmp.lt.s32.totalorder %s5505_s16, %s5558_s3 }
 0x218   : > { %p4112_p4 = scmp.lt.s32.totalorder %s4110_s27, %s4106_s5 }
 0x219   : > { %p4108_p0 = pnand %p4107_p13, %p4260_p3 }
 0x21a   : > { %p4113_p5 = por %p4112_p4, %p4111_p2 }
 0x21b   : > { %p4109_p1 = pneg %p4108_p0 }
 0x21d   : > { %p4114_p6 = pnand %p4113_p5, %p4109_p1 }
 0x21f   : > { %4117 = shalt.err (!%p4114_p6)
}
 0x220   : > { %3991 = dma.vmem_to_hbm [thread:$0]  (%p4260_p3), %s3339_s8, 32, %s5505_s16, %s3319_s9  }
 0x221 PF: > { %p3997_p7 = scmp.ge.s32.totalorder %s4184_s19, 2  ;;  %s3363_s29 = sand.u32 1, %s4156_s12  }
 0x222   : > { %s3364_s4 = scalar_lea.sflag [#allocation4], %s3363_s29 }
 0x223   : > { %p3994_p9 = pnand %p3997_p7, %p4269_p8 }
 0x225   : > { %p3995_p10 = pneg %p3994_p9 }
 0x227   : > { %4151 = dma.done.wait (%p3995_p10), %s3364_s4, 32  }
 0x228   : > { %4153 = vsyncadd (%p3995_p10), %s3364_s4, 4294967264  ;;  %s17_s19 = sadd.s32 1, %s4184_s19   ;;  %s5613_s25 = sld [smem:[#allocation6_spill]] }
 0x229   : > { %p14_p11 = scmp.ge.s32.totalorder %s17_s19, 6   ;;  %s5614_s12 = smov %s4160_s13 }
 0x22a   : > { %s5615_s13 = smov %s4164_s14  ;;  %s5616_s14 = smov %s4278_s30 }
 0x22b   : > { %s5617_s15 = smov %s4176_s17  ;;  %s5618_s16 = smov %s4180_s18 }
 0x22c   : > { %s5619_s17 = smov %s5622_s22  ;;  %16 = sbr.rel (!%p14_p11) target bundleno = 5 (0x5), region = 98 }
 0x22e   : > { %s5620_s18 = smov %s5613_s25 }
 0x231   :  { %3369 = vsyncpa [#allocation4], 1 }
 0x232   :  { %3371 = vsyncpa [#allocation4 + $0x1], 1 }

</bundles_post_ra>
